<compile_context>
chip_gen: v7x
topology: tpu7x:2x2x1
jax: 0.10.0
libtpu: 0.0.40
codegen_flags: <defaults>
</compile_context>

<pallas_src>
import jax
import jax.numpy as jnp
import numpy as np
from jax import lax
from jax.experimental import pallas as pl
from jax.experimental.pallas import tpu as pltpu

LN_EPS = 1e-5  # torch.nn.LayerNorm default eps
F32 = jnp.float32
BF16 = jnp.bfloat16

# Rows of the packed [12, Cout_pad] bias / LayerNorm-affine slab.
(R_B1, R_G1, R_BT1, R_B2, R_BE1, R_GE, R_BTE, R_BE2,
 R_BU, R_GF, R_BF, R_BR) = range(12)
NUM_VEC_ROWS = 12


def _round_up(v, m):
    return ((v + m - 1) // m) * m


def _ln_padded(h, gamma, beta, real_width):
    """LayerNorm over the last axis where only the first `real_width` columns
    are real and all padded columns are guaranteed exactly zero on input."""
    inv = 1.0 / float(real_width)
    mu = jnp.sum(h, axis=-1, keepdims=True) * inv
    ex2 = jnp.sum(h * h, axis=-1, keepdims=True) * inv
    var = ex2 - mu * mu
    return (h - mu) * lax.rsqrt(var + LN_EPS) * gamma + beta


def _layernorm(h, gamma, beta):
    mu = jnp.mean(h, axis=-1, keepdims=True)
    var = jnp.mean((h - mu) ** 2, axis=-1, keepdims=True)
    return (h - mu) * lax.rsqrt(var + LN_EPS) * gamma + beta


# -----------------------------------------------------------------------------
# Kernels
# -----------------------------------------------------------------------------
def _make_se3_kernel(*, n_nodes, c_out, cin_p, cout_p, t_e, n_blocks,
                     has_residual, off):
    """Main kernel: grid = (n_blocks,) over edge tiles (reduction axis)."""

    def kernel(srcc_ref, dstc_ref, dstr_ref, x_ref, ea_ref, vecs_ref,
               we1_ref, wbig_ref,                # VMEM inputs
               out_ref,                          # VMEM output
               hagg_ref, hnodes_ref):            # persistent VMEM scratch
        eb = pl.program_id(0)

        def vrow(i):                              # static row slice, [1, Cout_pad]
            return vecs_ref[i:i + 1, :]

        def wslab(name, rows):                    # static row slice of weight slab
            o = off[name]
            return wbig_ref[o:o + rows, :]

        # ---- block-0 prologue: zero the scatter accumulator and run the node
        #      MLP once (overlaps with subsequent edge blocks) ----
        @pl.when(eb == 0)
        def _():
            hagg_ref[...] = jnp.zeros_like(hagg_ref)
            xb0 = x_ref[...].astype(BF16)
            h = (jnp.dot(xb0, wslab("w1", cin_p), preferred_element_type=F32)
                 + vrow(R_B1))
            h = _ln_padded(h, vrow(R_G1), vrow(R_BT1), c_out)
            h = jnp.maximum(h, 0.0)
            hnodes_ref[...] = (jnp.dot(h.astype(BF16), wslab("w2", cout_p),
                                       preferred_element_type=F32) + vrow(R_B2))

        # ---- edge block: one-hot gather (MXU), fused edge MLP, one-hot scatter ----
        src = srcc_ref[...]                       # [t_e, 1] int32
        dst_col = dstc_ref[...]                   # [t_e, 1] int32
        dst_row = dstr_ref[...]                   # [1, t_e] int32

        node_iota = lax.broadcasted_iota(jnp.int32, (t_e, n_nodes), 1)
        oh_src = (node_iota == src).astype(F32).astype(BF16)      # [t_e, N]
        oh_dst = (node_iota == dst_col).astype(F32).astype(BF16)  # [t_e, N]

        xb = x_ref[...].astype(BF16)
        hs = jnp.dot(oh_src, xb, preferred_element_type=F32)      # == x_bf16[src]
        hd = jnp.dot(oh_dst, xb, preferred_element_type=F32)      # == x_bf16[dst]

        feat = jnp.concatenate(
            [hs.astype(BF16), hd.astype(BF16), ea_ref[...].astype(BF16)], axis=1)
        he = jnp.dot(feat, we1_ref[...], preferred_element_type=F32) + vrow(R_BE1)
        he = _ln_padded(he, vrow(R_GE), vrow(R_BTE), c_out)
        he = jnp.maximum(he, 0.0)
        h_edges = (jnp.dot(he.astype(BF16), wslab("we2", cout_p),
                           preferred_element_type=F32) + vrow(R_BE2))

        # scatter-add over dst; padded edges carry sentinel dst == N so their
        # one-hot column is all-zero and they never touch real node rows.
        oh_scat = (lax.broadcasted_iota(jnp.int32, (n_nodes, t_e), 0)
                   == dst_row).astype(F32).astype(BF16)            # [N, t_e]
        hagg_ref[...] += jnp.dot(oh_scat, h_edges.astype(BF16),
                                 preferred_element_type=F32)

        # ---- finalize: update + residual + final LayerNorm on the last block ----
        @pl.when(eb == n_blocks - 1)
        def _():
            h_out = (jnp.dot(hnodes_ref[...].astype(BF16), wslab("wun", cout_p),
                             preferred_element_type=F32)
                     + jnp.dot(hagg_ref[...].astype(BF16), wslab("wua", cout_p),
                               preferred_element_type=F32)
                     + vrow(R_BU))
            if has_residual:
                h_out = h_out + x_ref[...]        # identity residual, no matmul
            else:
                h_out = (h_out
                         + jnp.dot(x_ref[...].astype(BF16), wslab("wr", cin_p),
                                   preferred_element_type=F32)
                         + vrow(R_BR))
            out_ref[...] = _ln_padded(h_out, vrow(R_GF), vrow(R_BF), c_out)

    return kernel


def _make_nodes_only_kernel(*, c_out, cin_p, cout_p, has_residual, off):
    """PyTorch E == 0 early-return branch: LN(node_mlp(x) + residual)."""

    def kernel(x_ref, vecs_ref, wbig_ref, out_ref):
        def vrow(i):
            return vecs_ref[i:i + 1, :]

        xb = x_ref[...].astype(BF16)
        h = (jnp.dot(xb, wbig_ref[off["w1"]:off["w1"] + cin_p, :],
                     preferred_element_type=F32) + vrow(R_B1))
        h = _ln_padded(h, vrow(R_G1), vrow(R_BT1), c_out)
        h = jnp.maximum(h, 0.0)
        h_nodes = (jnp.dot(h.astype(BF16),
                           wbig_ref[off["w2"]:off["w2"] + cout_p, :],
                           preferred_element_type=F32) + vrow(R_B2))
        if has_residual:
            h_out = h_nodes + x_ref[...]
        else:
            h_out = (h_nodes
                     + jnp.dot(xb, wbig_ref[off["wr"]:off["wr"] + cin_p, :],
                               preferred_element_type=F32)
                     + vrow(R_BR))
        out_ref[...] = _ln_padded(h_out, vrow(R_GF), vrow(R_BF), c_out)

    return kernel


# -----------------------------------------------------------------------------
# Parameter packing (channel padding to 128-lane multiples) + wrapper
# -----------------------------------------------------------------------------
def _pack_params(params, c_in, c_out, cin_p, cout_p, e_dim, ed_p, has_residual):
    def padvec(v):
        return jnp.pad(v.astype(F32), (0, cout_p - c_out))

    def padmat(w, rows_p):
        return jnp.pad(w.astype(F32),
                       ((0, rows_p - w.shape[0]), (0, cout_p - w.shape[1]))
                       ).astype(BF16)

    zero = jnp.zeros((c_out,), F32)
    br = zero if has_residual else params["br"]
    # NOTE: gammas are padded with ZEROS so padded LayerNorm output columns
    # stay exactly zero (the padding invariant the kernel relies on).
    vecs = jnp.stack([
        padvec(params["b1"]), padvec(params["g1"]), padvec(params["bt1"]),
        padvec(params["b2"]), padvec(params["be1"]), padvec(params["ge"]),
        padvec(params["bte"]), padvec(params["be2"]), padvec(params["bu"]),
        padvec(params["gf"]), padvec(params["bf"]), padvec(br)], axis=0)

    we1 = params["we1"]                               # [2*c_in + e_dim, c_out]
    we1_packed = jnp.concatenate([
        padmat(we1[:c_in], cin_p),
        padmat(we1[c_in:2 * c_in], cin_p),
        padmat(we1[2 * c_in:], ed_p)], axis=0)        # [2*cin_p + ed_p, cout_p]

    wu = params["wu"]                                 # [2*c_out, c_out]
    mats = [padmat(params["w1"], cin_p),
            padmat(params["we2"], cout_p),
            padmat(params["w2"], cout_p),
            padmat(wu[:c_out], cout_p),
            padmat(wu[c_out:], cout_p)]
    off = {"w1": 0, "we2": cin_p, "w2": cin_p + cout_p,
           "wun": cin_p + 2 * cout_p, "wua": cin_p + 3 * cout_p}
    if not has_residual:
        off["wr"] = cin_p + 4 * cout_p
        mats.append(padmat(params["wr"], cin_p))
    wbig = jnp.concatenate(mats, axis=0)
    return vecs, we1_packed, wbig, off


def se3_layer_forward(params, x, edge_index, edge_attr, pos, *, tile_e=512):
    # pos is unused by the PyTorch forward; kept for signature parity.
    del pos
    n, c_in = x.shape
    c_out = params["w2"].shape[1]
    e_dim = edge_attr.shape[1]
    e = edge_index.shape[1]
    has_residual = (c_in == c_out)

    cin_p = _round_up(c_in, 128)
    cout_p = _round_up(c_out, 128)
    ed_p = _round_up(e_dim, 128)

    vecs, we1_packed, wbig, off = _pack_params(
        params, c_in, c_out, cin_p, cout_p, e_dim, ed_p, has_residual)
    x_p = jnp.pad(x.astype(F32), ((0, 0), (0, cin_p - c_in)))

    if e == 0:
        # PyTorch early-return branch: LN(node_mlp(x) + residual), no update.
        kernel = _make_nodes_only_kernel(c_out=c_out, cin_p=cin_p, cout_p=cout_p,
                                         has_residual=has_residual, off=off)
        out = pl.pallas_call(
            kernel,
            out_shape=jax.ShapeDtypeStruct((n, cout_p), F32),
            in_specs=[pl.BlockSpec(memory_space=pltpu.MemorySpace.VMEM)] * 3,
            out_specs=pl.BlockSpec(memory_space=pltpu.MemorySpace.VMEM),
        )(x_p, vecs, wbig)
        return out[:, :c_out]

    # Edge tiling (reduction axis). Per-block streamed footprint is tiny, so a
    # large tile amortizes the ~0.35us grid-step overhead on all generations.
    t_e = min(_round_up(tile_e, 128), _round_up(e, 128))
    e_pad = _round_up(e, t_e)
    n_blocks = e_pad // t_e

    # Sentinel index == n for padded tail edges -> all-zero one-hot rows/cols.
    src = jnp.pad(edge_index[0].astype(jnp.int32), (0, e_pad - e),
                  constant_values=n)
    dst = jnp.pad(edge_index[1].astype(jnp.int32), (0, e_pad - e),
                  constant_values=n)
    src_col = src[:, None]                # [E_pad, 1]  (sublane orientation)
    dst_col = dst[:, None]                # [E_pad, 1]
    dst_row = dst[None, :]                # [1, E_pad]  (lane orientation, scatter)
    ea = jnp.pad(edge_attr.astype(F32), ((0, e_pad - e), (0, ed_p - e_dim)))

    kernel = _make_se3_kernel(n_nodes=n, c_out=c_out, cin_p=cin_p, cout_p=cout_p,
                              t_e=t_e, n_blocks=n_blocks,
                              has_residual=has_residual, off=off)

    grid_spec = pltpu.PrefetchScalarGridSpec(
        num_scalar_prefetch=0,
        grid=(n_blocks,),
        in_specs=[
            pl.BlockSpec((t_e, 1), lambda eb: (eb, 0)),            # src (col)
            pl.BlockSpec((t_e, 1), lambda eb: (eb, 0)),            # dst (col)
            pl.BlockSpec((1, t_e), lambda eb: (0, eb)),            # dst (row)
            pl.BlockSpec((n, cin_p), lambda eb: (0, 0)),           # x (resident)
            pl.BlockSpec((t_e, ed_p), lambda eb: (eb, 0)),         # edge_attr stream
            pl.BlockSpec((NUM_VEC_ROWS, cout_p), lambda eb: (0, 0)),
            pl.BlockSpec(we1_packed.shape, lambda eb: (0, 0)),
            pl.BlockSpec(wbig.shape, lambda eb: (0, 0)),
        ],
        out_specs=pl.BlockSpec((n, cout_p), lambda eb: (0, 0)),
        scratch_shapes=[
            pltpu.VMEM((n, cout_p), F32),    # h_agg accumulator (persists)
            pltpu.VMEM((n, cout_p), F32),    # h_nodes (computed on block 0)
        ],
    )

    # VMEM budget: dominated by the resident node-dim arrays + weight slabs;
    # streamed edge-block buffers are tiny even when double-buffered.
    est = (n * (cin_p + 3 * cout_p) * 4
           + NUM_VEC_ROWS * cout_p * 4
           + (we1_packed.shape[0] + wbig.shape[0]) * cout_p * 2
           + 2 * t_e * (ed_p * 4 + 3 * 4))
    vmem_limit = int(min(max(2 * est, 32 * 1024 * 1024), 96 * 1024 * 1024))

    out = pl.pallas_call(
        kernel,
        out_shape=jax.ShapeDtypeStruct((n, cout_p), F32),
        grid_spec=grid_spec,
        compiler_params=pltpu.CompilerParams(
            dimension_semantics=("arbitrary",),   # edge axis is a reduction
            vmem_limit_bytes=vmem_limit,
        ),
    )(src_col, dst_col, dst_row, x_p, ea, vecs, we1_packed, wbig)
    return out[:, :c_out]


# -----------------------------------------------------------------------------
# Parameters & pure-JAX reference (mirrors kernel numerics: bf16 operands,
# f32 accumulation / LayerNorm)
# -----------------------------------------------------------------------------
def init_params(key, in_channels, out_channels, edge_dim):
    ks = jax.random.split(key, 8)

    def lin(k, fan_in, fan_out):
        kw, kb = jax.random.split(k)
        s = 1.0 / np.sqrt(fan_in)
        w = jax.random.uniform(kw, (fan_in, fan_out), F32, -s, s)
        b = jax.random.uniform(kb, (fan_out,), F32, -s, s)
        return w, b

    p = {}
    p["w1"], p["b1"] = lin(ks[0], in_channels, out_channels)
    p["g1"] = jnp.ones((out_channels,), F32)
    p["bt1"] = jnp.zeros((out_channels,), F32)
    p["w2"], p["b2"] = lin(ks[1], out_channels, out_channels)

    p["we1"], p["be1"] = lin(ks[2], in_channels * 2 + edge_dim, out_channels)
    p["ge"] = jnp.ones((out_channels,), F32)
    p["bte"] = jnp.zeros((out_channels,), F32)
    p["we2"], p["be2"] = lin(ks[3], out_channels, out_channels)

    p["wu"], p["bu"] = lin(ks[4], out_channels * 2, out_channels)

    if in_channels != out_channels:
        p["wr"], p["br"] = lin(ks[5], in_channels, out_channels)

    p["gf"] = jnp.ones((out_channels,), F32)
    p["bf"] = jnp.zeros((out_channels,), F32)
    return p


def se3_reference_bf16(params, x, edge_index, edge_attr):
    c_in = x.shape[1]
    c_out = params["w2"].shape[1]
    has_residual = c_in == c_out
    cast = lambda a: a.astype(BF16)
    xb = cast(x)

    h = jnp.dot(xb, cast(params["w1"]), preferred_element_type=F32) + params["b1"]
    h = _layernorm(h, params["g1"], params["bt1"])
    h = jnp.maximum(h, 0.0)
    h_nodes = (jnp.dot(cast(h), cast(params["w2"]), preferred_element_type=F32)
               + params["b2"])

    if edge_index.shape[1] == 0:
        if has_residual:
            h_out = h_nodes + x
        else:
            h_out = (h_nodes + jnp.dot(xb, cast(params["wr"]),
                                       preferred_element_type=F32) + params["br"])
        return _layernorm(h_out, params["gf"], params["bf"])

    src, dst = edge_index[0], edge_index[1]
    we1 = params["we1"]
    he = (jnp.dot(cast(x[src]), cast(we1[:c_in]), preferred_element_type=F32)
          + jnp.dot(cast(x[dst]), cast(we1[c_in:2 * c_in]), preferred_element_type=F32)
          + jnp.dot(cast(edge_attr), cast(we1[2 * c_in:]), preferred_element_type=F32)
          + params["be1"])
    he = _layernorm(he, params["ge"], params["bte"])
    he = jnp.maximum(he, 0.0)
    h_edges = (jnp.dot(cast(he), cast(params["we2"]), preferred_element_type=F32)
               + params["be2"])

    # Mirror the kernel's bf16-operand scatter matmul.
    h_agg = jnp.zeros_like(h_nodes).at[dst].add(h_edges.astype(BF16).astype(F32))

    wu = params["wu"]
    h_out = (jnp.dot(cast(h_nodes), cast(wu[:c_out]), preferred_element_type=F32)
             + jnp.dot(cast(h_agg), cast(wu[c_out:]), preferred_element_type=F32)
             + params["bu"])
    if has_residual:
        h_out = h_out + x
    else:
        h_out = (h_out + jnp.dot(xb, cast(params["wr"]), preferred_element_type=F32)
                 + params["br"])
    return _layernorm(h_out, params["gf"], params["bf"])


# -----------------------------------------------------------------------------
if __name__ == "__main__":
    key = jax.random.PRNGKey(0)

    def build_case(k, n, c_in, c_out, edge_dim, e):
        k_x, k_ea, k_src, k_dst, k_par = jax.random.split(k, 5)
        x = jax.random.normal(k_x, (n, c_in), F32)
        if e > 0:
            edge_attr = jax.random.normal(k_ea, (e, edge_dim), F32)
            src = jax.random.randint(k_src, (e,), 0, n, jnp.int32)
            dst = jax.random.randint(k_dst, (e,), 0, n, jnp.int32)
            edge_index = jnp.stack([src, dst], axis=0)
        else:
            edge_attr = jnp.zeros((0, edge_dim), F32)
            edge_index = jnp.zeros((2, 0), jnp.int32)
        pos = jnp.zeros((n, 3), F32)            # unused, parity only
        params = init_params(k_par, c_in, c_out, edge_dim)
        return params, x, edge_index, edge_attr, pos

    k1, k2, k3 = jax.random.split(key, 3)

    # Case 1: projection residual (Cin != Cout), E not a multiple of the tile.
    params, x, ei, ea, pos = build_case(k1, n=8, c_in=16, c_out=32, edge_dim=5, e=14)
    out = jax.block_until_ready(se3_layer_forward(params, x, ei, ea, pos))
    ref = jax.block_until_ready(se3_reference_bf16(params, x, ei, ea))
    np.testing.assert_allclose(np.asarray(out), np.asarray(ref),
                               rtol=5e-3, atol=5e-3)

    # Case 2: PyTorch E == 0 early-return branch.
    params0, x0, ei0, ea0, pos0 = build_case(k2, n=8, c_in=16, c_out=32,
                                             edge_dim=5, e=0)
    out0 = jax.block_until_ready(se3_layer_forward(params0, x0, ei0, ea0, pos0))
    ref0 = jax.block_until_ready(se3_reference_bf16(params0, x0, ei0, ea0))
    np.testing.assert_allclose(np.asarray(out0), np.asarray(ref0),
                               rtol=5e-3, atol=5e-3)

    # Case 3: identity residual (Cin == Cout).
    paramsr, xr, eir, ear, posr = build_case(k3, n=8, c_in=32, c_out=32,
                                             edge_dim=5, e=20)
    outr = jax.block_until_ready(se3_layer_forward(paramsr, xr, eir, ear, posr))
    refr = jax.block_until_ready(se3_reference_bf16(paramsr, xr, eir, ear))
    np.testing.assert_allclose(np.asarray(outr), np.asarray(refr),
                               rtol=5e-3, atol=5e-3)

    print("KERNEL_OK")
</pallas_src>

<mosaic_0001>
module attributes {stable_mosaic.version = 11 : i64} {
  func.func @kernel(%arg0: i32, %arg1: memref<128x1xi32, #tpu.memory_space<vmem>>, %arg2: memref<128x1xi32, #tpu.memory_space<vmem>>, %arg3: memref<1x128xi32, #tpu.memory_space<vmem>>, %arg4: memref<8x128xf32, #tpu.memory_space<vmem>>, %arg5: memref<128x128xf32, #tpu.memory_space<vmem>>, %arg6: memref<12x128xf32, #tpu.memory_space<vmem>>, %arg7: memref<384x128xbf16, #tpu.memory_space<vmem>>, %arg8: memref<768x128xbf16, #tpu.memory_space<vmem>>, %arg9: memref<8x128xf32, #tpu.memory_space<vmem>>, %arg10: memref<8x128xf32, #tpu.memory_space<vmem>>, %arg11: memref<8x128xf32, #tpu.memory_space<vmem>>) attributes {dimension_semantics = [#tpu.dimension_semantics<arbitrary>], iteration_bounds = array<i64: 1>, scalar_prefetch = 0 : i64, scratch_operands = 2 : i64, tpu.core_type = #tpu.core_type<tc>, window_params = [{transform_indices = @transform_0, window_bounds = array<i64: 128, 1>}, {transform_indices = @transform_1, window_bounds = array<i64: 128, 1>}, {transform_indices = @transform_2, window_bounds = array<i64: 1, 128>}, {pipeline_mode = #tpu.pipeline_mode<synchronous>, transform_indices = @transform_3, window_bounds = array<i64: 8, 128>}, {transform_indices = @transform_4, window_bounds = array<i64: 128, 128>}, {pipeline_mode = #tpu.pipeline_mode<synchronous>, transform_indices = @transform_5, window_bounds = array<i64: 12, 128>}, {pipeline_mode = #tpu.pipeline_mode<synchronous>, transform_indices = @transform_6, window_bounds = array<i64: 384, 128>}, {pipeline_mode = #tpu.pipeline_mode<synchronous>, transform_indices = @transform_7, window_bounds = array<i64: 768, 128>}, {pipeline_mode = #tpu.pipeline_mode<synchronous>, transform_indices = @transform_8, window_bounds = array<i64: 8, 128>}]} {
    %c0_i32 = arith.constant 0 : i32
    %0 = arith.cmpi eq, %arg0, %c0_i32 : i32
    %1 = arith.extui %0 : i1 to i32
    %c0_i32_0 = arith.constant 0 : i32
    %2 = arith.cmpi ne, %1, %c0_i32_0 : i32
    scf.if %2 {
      %cst_33 = arith.constant 0.000000e+00 : f32
      %77 = vector.broadcast %cst_33 : f32 to vector<8x128xf32>
      %c0_34 = arith.constant 0 : index
      %c0_35 = arith.constant 0 : index
      %78 = vector.load %arg10[%c0_34, %c0_35] : memref<8x128xf32, #tpu.memory_space<vmem>>, vector<8x128xf32>
      tpu.vector_store %arg10[%c0_34, %c0_35], %77 {strides = array<i32>} : memref<8x128xf32, #tpu.memory_space<vmem>>, vector<8x128xf32>,
      %c0_36 = arith.constant 0 : index
      %c0_37 = arith.constant 0 : index
      %79 = vector.load %arg4[%c0_36, %c0_37] : memref<8x128xf32, #tpu.memory_space<vmem>>, vector<8x128xf32>
      %80 = arith.truncf %79 : vector<8x128xf32> to vector<8x128xbf16>
      %c0_38 = arith.constant 0 : index
      %c0_39 = arith.constant 0 : index
      %81 = vector.load %arg8[%c0_38, %c0_39] : memref<768x128xbf16, #tpu.memory_space<vmem>>, vector<128x128xbf16>
      %cst_40 = arith.constant dense<0.000000e+00> : vector<8x128xf32>
      %82 = tpu.matmul %80, %81, %cst_40 {dimension_numbers = #tpu.dot_dimension_numbers<[1], [0], [0], [1], [0, 0, 1, 1], [], []>} : vector<8x128xbf16>, vector<128x128xbf16>, vector<8x128xf32> -> vector<8x128xf32>
      %c0_41 = arith.constant 0 : index
      %c0_42 = arith.constant 0 : index
      %83 = vector.load %arg6[%c0_41, %c0_42] : memref<12x128xf32, #tpu.memory_space<vmem>>, vector<1x128xf32>
      %84 = vector.broadcast %83 : vector<1x128xf32> to vector<8x128xf32>
      %85 = arith.addf %82, %84 : vector<8x128xf32>
      %c1 = arith.constant 1 : index
      %c0_43 = arith.constant 0 : index
      %86 = vector.load %arg6[%c1, %c0_43] : memref<12x128xf32, #tpu.memory_space<vmem>>, vector<1x128xf32>
      %c2 = arith.constant 2 : index
      %c0_44 = arith.constant 0 : index
      %87 = vector.load %arg6[%c2, %c0_44] : memref<12x128xf32, #tpu.memory_space<vmem>>, vector<1x128xf32>
      %cst_45 = arith.constant dense<0.000000e+00> : vector<8xf32>
      %88 = vector.multi_reduction <add>, %85, %cst_45 [1] : vector<8x128xf32> to vector<8xf32>
      %89 = vector.shape_cast %88 : vector<8xf32> to vector<8x1xf32>
      %cst_46 = arith.constant 3.125000e-02 : f32
      %90 = vector.broadcast %cst_46 : f32 to vector<8x1xf32>
      %91 = arith.mulf %89, %90 : vector<8x1xf32>
      %92 = arith.mulf %85, %85 : vector<8x128xf32>
      %cst_47 = arith.constant dense<0.000000e+00> : vector<8xf32>
      %93 = vector.multi_reduction <add>, %92, %cst_47 [1] : vector<8x128xf32> to vector<8xf32>
      %94 = vector.shape_cast %93 : vector<8xf32> to vector<8x1xf32>
      %cst_48 = arith.constant 3.125000e-02 : f32
      %95 = vector.broadcast %cst_48 : f32 to vector<8x1xf32>
      %96 = arith.mulf %94, %95 : vector<8x1xf32>
      %97 = arith.mulf %91, %91 : vector<8x1xf32>
      %98 = arith.subf %96, %97 : vector<8x1xf32>
      %99 = vector.broadcast %91 : vector<8x1xf32> to vector<8x128xf32>
      %100 = arith.subf %85, %99 : vector<8x128xf32>
      %cst_49 = arith.constant 9.99999974E-6 : f32
      %101 = vector.broadcast %cst_49 : f32 to vector<8x1xf32>
      %102 = arith.addf %98, %101 : vector<8x1xf32>
      %103 = math.rsqrt %102 : vector<8x1xf32>
      %104 = vector.broadcast %103 : vector<8x1xf32> to vector<8x128xf32>
      %105 = arith.mulf %100, %104 : vector<8x128xf32>
      %106 = vector.broadcast %86 : vector<1x128xf32> to vector<8x128xf32>
      %107 = arith.mulf %105, %106 : vector<8x128xf32>
      %108 = vector.broadcast %87 : vector<1x128xf32> to vector<8x128xf32>
      %109 = arith.addf %107, %108 : vector<8x128xf32>
      %cst_50 = arith.constant 0.000000e+00 : f32
      %110 = vector.broadcast %cst_50 : f32 to vector<8x128xf32>
      %111 = arith.maximumf %109, %110 : vector<8x128xf32>
      %112 = arith.truncf %111 : vector<8x128xf32> to vector<8x128xbf16>
      %c256 = arith.constant 256 : index
      %c0_51 = arith.constant 0 : index
      %113 = vector.load %arg8[%c256, %c0_51] : memref<768x128xbf16, #tpu.memory_space<vmem>>, vector<128x128xbf16>
      %cst_52 = arith.constant dense<0.000000e+00> : vector<8x128xf32>
      %114 = tpu.matmul %112, %113, %cst_52 {dimension_numbers = #tpu.dot_dimension_numbers<[1], [0], [0], [1], [0, 0, 1, 1], [], []>} : vector<8x128xbf16>, vector<128x128xbf16>, vector<8x128xf32> -> vector<8x128xf32>
      %c3 = arith.constant 3 : index
      %c0_53 = arith.constant 0 : index
      %115 = vector.load %arg6[%c3, %c0_53] : memref<12x128xf32, #tpu.memory_space<vmem>>, vector<1x128xf32>
      %116 = vector.broadcast %115 : vector<1x128xf32> to vector<8x128xf32>
      %117 = arith.addf %114, %116 : vector<8x128xf32>
      %c0_54 = arith.constant 0 : index
      %c0_55 = arith.constant 0 : index
      %118 = vector.load %arg11[%c0_54, %c0_55] : memref<8x128xf32, #tpu.memory_space<vmem>>, vector<8x128xf32>
      tpu.vector_store %arg11[%c0_54, %c0_55], %117 {strides = array<i32>} : memref<8x128xf32, #tpu.memory_space<vmem>>, vector<8x128xf32>,
    } else {
    }
    %c0 = arith.constant 0 : index
    %c0_1 = arith.constant 0 : index
    %3 = vector.load %arg1[%c0, %c0_1] : memref<128x1xi32, #tpu.memory_space<vmem>>, vector<128x1xi32>
    %c0_2 = arith.constant 0 : index
    %c0_3 = arith.constant 0 : index
    %4 = vector.load %arg2[%c0_2, %c0_3] : memref<128x1xi32, #tpu.memory_space<vmem>>, vector<128x1xi32>
    %c0_4 = arith.constant 0 : index
    %c0_5 = arith.constant 0 : index
    %5 = vector.load %arg3[%c0_4, %c0_5] : memref<1x128xi32, #tpu.memory_space<vmem>>, vector<1x128xi32>
    %6 = tpu.iota {dimensions = array<i32: 1>} : vector<128x8xi32>
    %7 = vector.broadcast %3 : vector<128x1xi32> to vector<128x8xi32>
    %8 = arith.cmpi eq, %6, %7 : vector<128x8xi32>
    %9 = arith.extui %8 : vector<128x8xi1> to vector<128x8xi32>
    %10 = arith.sitofp %9 : vector<128x8xi32> to vector<128x8xf32>
    %11 = arith.truncf %10 : vector<128x8xf32> to vector<128x8xbf16>
    %12 = vector.broadcast %4 : vector<128x1xi32> to vector<128x8xi32>
    %13 = arith.cmpi eq, %6, %12 : vector<128x8xi32>
    %14 = arith.extui %13 : vector<128x8xi1> to vector<128x8xi32>
    %15 = arith.sitofp %14 : vector<128x8xi32> to vector<128x8xf32>
    %16 = arith.truncf %15 : vector<128x8xf32> to vector<128x8xbf16>
    %c0_6 = arith.constant 0 : index
    %c0_7 = arith.constant 0 : index
    %17 = vector.load %arg4[%c0_6, %c0_7] : memref<8x128xf32, #tpu.memory_space<vmem>>, vector<8x128xf32>
    %18 = arith.truncf %17 : vector<8x128xf32> to vector<8x128xbf16>
    %cst = arith.constant dense<0.000000e+00> : vector<128x128xf32>
    %19 = tpu.matmul %11, %18, %cst {dimension_numbers = #tpu.dot_dimension_numbers<[1], [0], [0], [1], [0, 0, 1, 1], [], []>} : vector<128x8xbf16>, vector<8x128xbf16>, vector<128x128xf32> -> vector<128x128xf32>
    %cst_8 = arith.constant dense<0.000000e+00> : vector<128x128xf32>
    %20 = tpu.matmul %16, %18, %cst_8 {dimension_numbers = #tpu.dot_dimension_numbers<[1], [0], [0], [1], [0, 0, 1, 1], [], []>} : vector<128x8xbf16>, vector<8x128xbf16>, vector<128x128xf32> -> vector<128x128xf32>
    %21 = arith.truncf %19 : vector<128x128xf32> to vector<128x128xbf16>
    %22 = arith.truncf %20 : vector<128x128xf32> to vector<128x128xbf16>
    %c0_9 = arith.constant 0 : index
    %c0_10 = arith.constant 0 : index
    %23 = vector.load %arg5[%c0_9, %c0_10] : memref<128x128xf32, #tpu.memory_space<vmem>>, vector<128x128xf32>
    %24 = arith.truncf %23 : vector<128x128xf32> to vector<128x128xbf16>
    %25 = tpu.concatenate %21, %22, %24 in 1 : vector<128x128xbf16>, vector<128x128xbf16>, vector<128x128xbf16> -> vector<128x384xbf16>
    %c0_11 = arith.constant 0 : index
    %c0_12 = arith.constant 0 : index
    %26 = vector.load %arg7[%c0_11, %c0_12] : memref<384x128xbf16, #tpu.memory_space<vmem>>, vector<384x128xbf16>
    %cst_13 = arith.constant dense<0.000000e+00> : vector<128x128xf32>
    %27 = tpu.matmul %25, %26, %cst_13 {dimension_numbers = #tpu.dot_dimension_numbers<[1], [0], [0], [1], [0, 0, 1, 1], [], []>} : vector<128x384xbf16>, vector<384x128xbf16>, vector<128x128xf32> -> vector<128x128xf32>
    %c4 = arith.constant 4 : index
    %c0_14 = arith.constant 0 : index
    %28 = vector.load %arg6[%c4, %c0_14] : memref<12x128xf32, #tpu.memory_space<vmem>>, vector<1x128xf32>
    %29 = vector.broadcast %28 : vector<1x128xf32> to vector<128x128xf32>
    %30 = arith.addf %27, %29 : vector<128x128xf32>
    %c5 = arith.constant 5 : index
    %c0_15 = arith.constant 0 : index
    %31 = vector.load %arg6[%c5, %c0_15] : memref<12x128xf32, #tpu.memory_space<vmem>>, vector<1x128xf32>
    %c6 = arith.constant 6 : index
    %c0_16 = arith.constant 0 : index
    %32 = vector.load %arg6[%c6, %c0_16] : memref<12x128xf32, #tpu.memory_space<vmem>>, vector<1x128xf32>
    %cst_17 = arith.constant dense<0.000000e+00> : vector<128xf32>
    %33 = vector.multi_reduction <add>, %30, %cst_17 [1] : vector<128x128xf32> to vector<128xf32>
    %34 = vector.shape_cast %33 : vector<128xf32> to vector<128x1xf32>
    %cst_18 = arith.constant 3.125000e-02 : f32
    %35 = vector.broadcast %cst_18 : f32 to vector<128x1xf32>
    %36 = arith.mulf %34, %35 : vector<128x1xf32>
    %37 = arith.mulf %30, %30 : vector<128x128xf32>
    %cst_19 = arith.constant dense<0.000000e+00> : vector<128xf32>
    %38 = vector.multi_reduction <add>, %37, %cst_19 [1] : vector<128x128xf32> to vector<128xf32>
    %39 = vector.shape_cast %38 : vector<128xf32> to vector<128x1xf32>
    %cst_20 = arith.constant 3.125000e-02 : f32
    %40 = vector.broadcast %cst_20 : f32 to vector<128x1xf32>
    %41 = arith.mulf %39, %40 : vector<128x1xf32>
    %42 = arith.mulf %36, %36 : vector<128x1xf32>
    %43 = arith.subf %41, %42 : vector<128x1xf32>
    %44 = vector.broadcast %36 : vector<128x1xf32> to vector<128x128xf32>
    %45 = arith.subf %30, %44 : vector<128x128xf32>
    %cst_21 = arith.constant 9.99999974E-6 : f32
    %46 = vector.broadcast %cst_21 : f32 to vector<128x1xf32>
    %47 = arith.addf %43, %46 : vector<128x1xf32>
    %48 = math.rsqrt %47 : vector<128x1xf32>
    %49 = vector.broadcast %48 : vector<128x1xf32> to vector<128x128xf32>
    %50 = arith.mulf %45, %49 : vector<128x128xf32>
    %51 = vector.broadcast %31 : vector<1x128xf32> to vector<128x128xf32>
    %52 = arith.mulf %50, %51 : vector<128x128xf32>
    %53 = vector.broadcast %32 : vector<1x128xf32> to vector<128x128xf32>
    %54 = arith.addf %52, %53 : vector<128x128xf32>
    %cst_22 = arith.constant 0.000000e+00 : f32
    %55 = vector.broadcast %cst_22 : f32 to vector<128x128xf32>
    %56 = arith.maximumf %54, %55 : vector<128x128xf32>
    %57 = arith.truncf %56 : vector<128x128xf32> to vector<128x128xbf16>
    %c128 = arith.constant 128 : index
    %c0_23 = arith.constant 0 : index
    %58 = vector.load %arg8[%c128, %c0_23] : memref<768x128xbf16, #tpu.memory_space<vmem>>, vector<128x128xbf16>
    %cst_24 = arith.constant dense<0.000000e+00> : vector<128x128xf32>
    %59 = tpu.matmul %57, %58, %cst_24 {dimension_numbers = #tpu.dot_dimension_numbers<[1], [0], [0], [1], [0, 0, 1, 1], [], []>} : vector<128x128xbf16>, vector<128x128xbf16>, vector<128x128xf32> -> vector<128x128xf32>
    %c7 = arith.constant 7 : index
    %c0_25 = arith.constant 0 : index
    %60 = vector.load %arg6[%c7, %c0_25] : memref<12x128xf32, #tpu.memory_space<vmem>>, vector<1x128xf32>
    %61 = vector.broadcast %60 : vector<1x128xf32> to vector<128x128xf32>
    %62 = arith.addf %59, %61 : vector<128x128xf32>
    %63 = tpu.iota {dimensions = array<i32: 0>} : vector<8x128xi32>
    %64 = vector.broadcast %5 : vector<1x128xi32> to vector<8x128xi32>
    %65 = arith.cmpi eq, %63, %64 : vector<8x128xi32>
    %66 = arith.extui %65 : vector<8x128xi1> to vector<8x128xi32>
    %67 = arith.sitofp %66 : vector<8x128xi32> to vector<8x128xf32>
    %68 = arith.truncf %67 : vector<8x128xf32> to vector<8x128xbf16>
    %c0_26 = arith.constant 0 : index
    %c0_27 = arith.constant 0 : index
    %69 = vector.load %arg10[%c0_26, %c0_27] : memref<8x128xf32, #tpu.memory_space<vmem>>, vector<8x128xf32>
    %70 = arith.truncf %62 : vector<128x128xf32> to vector<128x128xbf16>
    %cst_28 = arith.constant dense<0.000000e+00> : vector<8x128xf32>
    %71 = tpu.matmul %68, %70, %cst_28 {dimension_numbers = #tpu.dot_dimension_numbers<[1], [0], [0], [1], [0, 0, 1, 1], [], []>} : vector<8x128xbf16>, vector<128x128xbf16>, vector<8x128xf32> -> vector<8x128xf32>
    %72 = arith.addf %69, %71 : vector<8x128xf32>
    %c0_29 = arith.constant 0 : index
    %c0_30 = arith.constant 0 : index
    %73 = vector.load %arg10[%c0_29, %c0_30] : memref<8x128xf32, #tpu.memory_space<vmem>>, vector<8x128xf32>
    tpu.vector_store %arg10[%c0_29, %c0_30], %72 {strides = array<i32>} : memref<8x128xf32, #tpu.memory_space<vmem>>, vector<8x128xf32>,
    %c0_i32_31 = arith.constant 0 : i32
    %74 = arith.cmpi eq, %arg0, %c0_i32_31 : i32
    %75 = arith.extui %74 : i1 to i32
    %c0_i32_32 = arith.constant 0 : i32
    %76 = arith.cmpi ne, %75, %c0_i32_32 : i32
    scf.if %76 {
      %c0_33 = arith.constant 0 : index
      %c0_34 = arith.constant 0 : index
      %77 = vector.load %arg11[%c0_33, %c0_34] : memref<8x128xf32, #tpu.memory_space<vmem>>, vector<8x128xf32>
      %78 = arith.truncf %77 : vector<8x128xf32> to vector<8x128xbf16>
      %c384 = arith.constant 384 : index
      %c0_35 = arith.constant 0 : index
      %79 = vector.load %arg8[%c384, %c0_35] : memref<768x128xbf16, #tpu.memory_space<vmem>>, vector<128x128xbf16>
      %cst_36 = arith.constant dense<0.000000e+00> : vector<8x128xf32>
      %80 = tpu.matmul %78, %79, %cst_36 {dimension_numbers = #tpu.dot_dimension_numbers<[1], [0], [0], [1], [0, 0, 1, 1], [], []>} : vector<8x128xbf16>, vector<128x128xbf16>, vector<8x128xf32> -> vector<8x128xf32>
      %c0_37 = arith.constant 0 : index
      %c0_38 = arith.constant 0 : index
      %81 = vector.load %arg10[%c0_37, %c0_38] : memref<8x128xf32, #tpu.memory_space<vmem>>, vector<8x128xf32>
      %82 = arith.truncf %81 : vector<8x128xf32> to vector<8x128xbf16>
      %c512 = arith.constant 512 : index
      %c0_39 = arith.constant 0 : index
      %83 = vector.load %arg8[%c512, %c0_39] : memref<768x128xbf16, #tpu.memory_space<vmem>>, vector<128x128xbf16>
      %cst_40 = arith.constant dense<0.000000e+00> : vector<8x128xf32>
      %84 = tpu.matmul %82, %83, %cst_40 {dimension_numbers = #tpu.dot_dimension_numbers<[1], [0], [0], [1], [0, 0, 1, 1], [], []>} : vector<8x128xbf16>, vector<128x128xbf16>, vector<8x128xf32> -> vector<8x128xf32>
      %85 = arith.addf %80, %84 : vector<8x128xf32>
      %c8 = arith.constant 8 : index
      %c0_41 = arith.constant 0 : index
      %86 = vector.load %arg6[%c8, %c0_41] : memref<12x128xf32, #tpu.memory_space<vmem>>, vector<1x128xf32>
      %87 = vector.broadcast %86 : vector<1x128xf32> to vector<8x128xf32>
      %88 = arith.addf %85, %87 : vector<8x128xf32>
      %c0_42 = arith.constant 0 : index
      %c0_43 = arith.constant 0 : index
      %89 = vector.load %arg4[%c0_42, %c0_43] : memref<8x128xf32, #tpu.memory_space<vmem>>, vector<8x128xf32>
      %90 = arith.truncf %89 : vector<8x128xf32> to vector<8x128xbf16>
      %c640 = arith.constant 640 : index
      %c0_44 = arith.constant 0 : index
      %91 = vector.load %arg8[%c640, %c0_44] : memref<768x128xbf16, #tpu.memory_space<vmem>>, vector<128x128xbf16>
      %cst_45 = arith.constant dense<0.000000e+00> : vector<8x128xf32>
      %92 = tpu.matmul %90, %91, %cst_45 {dimension_numbers = #tpu.dot_dimension_numbers<[1], [0], [0], [1], [0, 0, 1, 1], [], []>} : vector<8x128xbf16>, vector<128x128xbf16>, vector<8x128xf32> -> vector<8x128xf32>
      %93 = arith.addf %88, %92 : vector<8x128xf32>
      %c11 = arith.constant 11 : index
      %c0_46 = arith.constant 0 : index
      %94 = vector.load %arg6[%c11, %c0_46] : memref<12x128xf32, #tpu.memory_space<vmem>>, vector<1x128xf32>
      %95 = vector.broadcast %94 : vector<1x128xf32> to vector<8x128xf32>
      %96 = arith.addf %93, %95 : vector<8x128xf32>
      %c9 = arith.constant 9 : index
      %c0_47 = arith.constant 0 : index
      %97 = vector.load %arg6[%c9, %c0_47] : memref<12x128xf32, #tpu.memory_space<vmem>>, vector<1x128xf32>
      %c10 = arith.constant 10 : index
      %c0_48 = arith.constant 0 : index
      %98 = vector.load %arg6[%c10, %c0_48] : memref<12x128xf32, #tpu.memory_space<vmem>>, vector<1x128xf32>
      %cst_49 = arith.constant dense<0.000000e+00> : vector<8xf32>
      %99 = vector.multi_reduction <add>, %96, %cst_49 [1] : vector<8x128xf32> to vector<8xf32>
      %100 = vector.shape_cast %99 : vector<8xf32> to vector<8x1xf32>
      %cst_50 = arith.constant 3.125000e-02 : f32
      %101 = vector.broadcast %cst_50 : f32 to vector<8x1xf32>
      %102 = arith.mulf %100, %101 : vector<8x1xf32>
      %103 = arith.mulf %96, %96 : vector<8x128xf32>
      %cst_51 = arith.constant dense<0.000000e+00> : vector<8xf32>
      %104 = vector.multi_reduction <add>, %103, %cst_51 [1] : vector<8x128xf32> to vector<8xf32>
      %105 = vector.shape_cast %104 : vector<8xf32> to vector<8x1xf32>
      %cst_52 = arith.constant 3.125000e-02 : f32
      %106 = vector.broadcast %cst_52 : f32 to vector<8x1xf32>
      %107 = arith.mulf %105, %106 : vector<8x1xf32>
      %108 = arith.mulf %102, %102 : vector<8x1xf32>
      %109 = arith.subf %107, %108 : vector<8x1xf32>
      %110 = vector.broadcast %102 : vector<8x1xf32> to vector<8x128xf32>
      %111 = arith.subf %96, %110 : vector<8x128xf32>
      %cst_53 = arith.constant 9.99999974E-6 : f32
      %112 = vector.broadcast %cst_53 : f32 to vector<8x1xf32>
      %113 = arith.addf %109, %112 : vector<8x1xf32>
      %114 = math.rsqrt %113 : vector<8x1xf32>
      %115 = vector.broadcast %114 : vector<8x1xf32> to vector<8x128xf32>
      %116 = arith.mulf %111, %115 : vector<8x128xf32>
      %117 = vector.broadcast %97 : vector<1x128xf32> to vector<8x128xf32>
      %118 = arith.mulf %116, %117 : vector<8x128xf32>
      %119 = vector.broadcast %98 : vector<1x128xf32> to vector<8x128xf32>
      %120 = arith.addf %118, %119 : vector<8x128xf32>
      %c0_54 = arith.constant 0 : index
      %c0_55 = arith.constant 0 : index
      %121 = vector.load %arg9[%c0_54, %c0_55] : memref<8x128xf32, #tpu.memory_space<vmem>>, vector<8x128xf32>
      tpu.vector_store %arg9[%c0_54, %c0_55], %120 {strides = array<i32>} : memref<8x128xf32, #tpu.memory_space<vmem>>, vector<8x128xf32>,
    } else {
    }
    return
  }
  func.func @transform_0(%arg0: i32) -> (i32, i32) {
    %c0_i32 = arith.constant 0 : i32
    %c0_i32_0 = arith.constant 0 : i32
    return %arg0, %c0_i32 : i32, i32
  }
  func.func @transform_1(%arg0: i32) -> (i32, i32) {
    %c0_i32 = arith.constant 0 : i32
    %c0_i32_0 = arith.constant 0 : i32
    return %arg0, %c0_i32 : i32, i32
  }
  func.func @transform_2(%arg0: i32) -> (i32, i32) {
    %c0_i32 = arith.constant 0 : i32
    %c0_i32_0 = arith.constant 0 : i32
    return %c0_i32, %arg0 : i32, i32
  }
  func.func @transform_3(%arg0: i32) -> (i32, i32) {
    %c0_i32 = arith.constant 0 : i32
    %c0_i32_0 = arith.constant 0 : i32
    %c0_i32_1 = arith.constant 0 : i32
    return %c0_i32, %c0_i32_0 : i32, i32
  }
  func.func @transform_4(%arg0: i32) -> (i32, i32) {
    %c0_i32 = arith.constant 0 : i32
    %c0_i32_0 = arith.constant 0 : i32
    return %arg0, %c0_i32 : i32, i32
  }
  func.func @transform_5(%arg0: i32) -> (i32, i32) {
    %c0_i32 = arith.constant 0 : i32
    %c0_i32_0 = arith.constant 0 : i32
    %c0_i32_1 = arith.constant 0 : i32
    return %c0_i32, %c0_i32_0 : i32, i32
  }
  func.func @transform_6(%arg0: i32) -> (i32, i32) {
    %c0_i32 = arith.constant 0 : i32
    %c0_i32_0 = arith.constant 0 : i32
    %c0_i32_1 = arith.constant 0 : i32
    return %c0_i32, %c0_i32_0 : i32, i32
  }
  func.func @transform_7(%arg0: i32) -> (i32, i32) {
    %c0_i32 = arith.constant 0 : i32
    %c0_i32_0 = arith.constant 0 : i32
    %c0_i32_1 = arith.constant 0 : i32
    return %c0_i32, %c0_i32_0 : i32, i32
  }
  func.func @transform_8(%arg0: i32) -> (i32, i32) {
    %c0_i32 = arith.constant 0 : i32
    %c0_i32_0 = arith.constant 0 : i32
    %c0_i32_1 = arith.constant 0 : i32
    return %c0_i32, %c0_i32_0 : i32, i32
  }
}

</mosaic_0001>

<bundles_post_ra>
// kernel: tpu_custom_call.1
= control target key start
LH: loop header
LB: loop body
LE: loop exit
PB: predicated region body
PF: predicated region fallthrough
CT: control target
= control target key end

     0   :  { %13 = vsyncpa [#allocation5], 0  ;;  %s3571_s0 = inlined_call_operand.vmem [shape: s32[128,1], index: 0, kind: input, shape index: {}]   ;;  %s3572_s1 = inlined_call_operand.vmem [shape: s32[128,1], index: 1, kind: input, shape index: {}]   ;;  %s3573_s2 = inlined_call_operand.vmem [shape: s32[1,128], index: 2, kind: input, shape index: {}]   ;;  %s3574_s3 = inlined_call_operand.vmem [shape: f32[8,128], index: 3, kind: input, shape index: {}]   ;;  %s3575_s4 = inlined_call_operand.hbm [shape: f32[128,128], index: 4, kind: input, shape index: {}]   ;;  %s3576_s5 = inlined_call_operand.vmem [shape: f32[12,128], index: 5, kind: input, shape index: {}]   ;;  %s3577_s6 = inlined_call_operand.vmem [shape: bf16[384,128], index: 6, kind: input, shape index: {}]   ;;  %s3578_s7 = inlined_call_operand.hbm [shape: bf16[768,128], index: 7, kind: input, shape index: {}]   ;;  %s3579_s8 = inlined_call_operand.hbm [shape: f32[8,128], index: 8, kind: output, shape index: {}]  }
   0x1   :  { %14 = vsyncpa [#allocation8], 0 }
   0x2   :  { %15 = vsyncpa [#allocation6], 0  ;;  %s2831_s27 = smov [#allocation4]   ;;  %s2759_s9 = scalar_lea.hbm %s3575_s4, 2048 }
   0x3   :  { %s29_s28 = sshll.u32 %s2831_s27, 4  ;;  %p2760_p0 = scmp.ne.s32.totalorder %s3575_s4, %s2759_s9  ;;  %s30_s28 = int_to_ptr.vmem [resolvable:$true] %s29_s28 }
   0x4   :  { %p2763_p1 = scmp.lt.u32.totalorder %s2759_s9, %s3575_s4 }
   0x6   :  { %p2765_p2 = pnand %p2763_p1, %p2760_p0 }
   0x8   :  { %2768 = shalt.err (!%p2765_p2)
}
   0x9   :  { %s2769_s14 = scalar_lea.vmem %s30_s28, 2048  ;;  %p2774_p4 = scmp.lt.s32.totalorder %s30_s28, %s30_s28 }
   0xa   :  { %p2770_p3 = scmp.ne.s32.totalorder %s30_s28, %s2769_s14  ;;  %p2775_p5 = scmp.lt.s32.totalorder %s2769_s14, %s2769_s14 }
   0xc   :  { %p2776_p6 = por %p2775_p5, %p2774_p4 }
   0xe   :  { %p2777_p7 = pnand %p2776_p6, %p2770_p3 }
  0x10   :  { %2780 = shalt.err (!%p2777_p7)
}
  0x11   :  { %s2832_s15 = smov 128   ;;  %s2833_s16 = smov 8  }
  0x12   :  { %35 = dma.hbm_to_vmem [thread:$0]  %s3575_s4, 2048, %s30_s28, [#allocation5], %s2832_s15, %s2832_s15, %s2833_s16  }
  0x13   :  { %s2834_s19 = smov [#allocation7]   ;;  %s2781_s23 = scalar_lea.hbm %s3578_s7, 6144 }
  0x14   :  { %s45_s20 = sshll.u32 %s2834_s19, 4  ;;  %p2782_p8 = scmp.ne.s32.totalorder %s3578_s7, %s2781_s23  ;;  %s46_s20 = int_to_ptr.vmem [resolvable:$true] %s45_s20 }
  0x15   :  { %p2785_p9 = scmp.lt.u32.totalorder %s2781_s23, %s3578_s7 }
  0x17   :  { %p2787_p10 = pnand %p2785_p9, %p2782_p8 }
  0x19   :  { %2790 = shalt.err (!%p2787_p10)
}
  0x1a   :  { %s2791_s29 = scalar_lea.vmem %s46_s20, 6144  ;;  %p2796_p12 = scmp.lt.s32.totalorder %s46_s20, %s46_s20 }
  0x1b   :  { %p2792_p11 = scmp.ne.s32.totalorder %s46_s20, %s2791_s29  ;;  %p2797_p13 = scmp.lt.s32.totalorder %s2791_s29, %s2791_s29 }
  0x1d   :  { %p2798_p0 = por %p2797_p13, %p2796_p12 }
  0x1f   :  { %p2799_p1 = pnand %p2798_p0, %p2792_p11 }
  0x21   :  { %2802 = shalt.err (!%p2799_p1)
}
  0x22   :  { %s2835_s4 = smov 64   ;;  %s2836_s28 = smov 4  }
  0x23   :  { %51 = dma.hbm_to_vmem [thread:$0]  %s3578_s7, 6144, %s46_s20, [#allocation8], %s2835_s4, %s2835_s4, %s2836_s28  }
  0x24   :  { %2825 = dma.done.wait [#allocation5], 2048  }
  0x25   :  { %2826 = vsyncadd [#allocation5], 4294965248 }
  0x26   :  { %2827 = dma.done.wait [#allocation8], 6144  }
  0x27   :  { %2828 = vsyncadd [#allocation8], 4294961152  ;;  %v2837_v0 = vmov 0.0   ;;  %vm2838_vm0 = vmmov 0   ;;  %v2839_v1 = vmov 0   ;;  %v2651_v2 = vld [vmem:[#allocation7] sm:$0xff]  }
  0x28   :  { %2416 = vmatprep.subr.bf16.mxu0 %v2837_v0  ;;  %2432 = vmatprep.mubr.msk.bf16.mxu0 %vm2838_vm0, %v2837_v0  ;;  %v2652_v3 = vld [vmem:[#allocation7 + $0x8] sm:$0xff]   ;;  %v2653_v4 = vld [vmem:[#allocation7 + $0x10] sm:$0xff]   ;;  %v328_v5 = vld [vmem:[%s3572_s1] sm:$0xff]  ;;  %vm582_vm1 = vcmask 1043456   ;;  %vm557_vm8 = vcmask 64512   ;;  %s2841_s22 = smov [#allocation9]  }
  0x29   :  { %2649 = vset.pattern.permute.xlu1 %v2839_v1  ;;  %2650 = vset.pattern.permute.xlu0 %v2839_v1  ;;  %v2654_v6 = vld [vmem:[#allocation7 + $0x18] sm:$0xff]   ;;  %v329_v7 = vld [vmem:[%s3572_s1 + $0x8] sm:$0xff]  ;;  %v2655_v8 = vld [vmem:[#allocation7 + $0x20] sm:$0xff]   ;;  %s2102_s23 = sshll.u32 %s2841_s22, 4  ;;  %s2103_s23 = int_to_ptr.vmem [resolvable:$true] %s2102_s23 }
  0x2a   :  { %2436 = vmatprep.subr.bf16.mxu1 %v2837_v0  ;;  %2452 = vmatprep.mubr.msk.bf16.mxu1 %vm2838_vm0, %v2837_v0  ;;  %v313_v9 = vld [vmem:[%s3571_s0 + $0x8] sm:$0xff]  ;;  %v330_v11 = vld [vmem:[%s3572_s1 + $0x10] sm:$0xff]  ;;  %v331_v13 = vld [vmem:[%s3572_s1 + $0x18] sm:$0xff]  ;;  %s2803_s24 = scalar_lea.vmem %s2103_s23, 128  ;;  %p2808_p3 = scmp.lt.s32.totalorder %s2103_s23, %s2103_s23 }
  0x2b   :  { %2417 = vmatpush3.bf16.msra.mxu0 %v2651_v2  ;;  %452 = vperm.xlu1 %2649, %v328_v5   ;;  %v2656_v10 = vld [vmem:[#allocation7 + $0x28] sm:$0xff]   ;;  %v2657_v12 = vld [vmem:[#allocation7 + $0x30] sm:$0xff]   ;;  %v2658_v14 = vld [vmem:[#allocation7 + $0x38] sm:$0xff]   ;;  %p2804_p2 = scmp.ne.s32.totalorder %s2103_s23, %s2803_s24  ;;  %p2809_p4 = scmp.lt.s32.totalorder %s2803_s24, %s2803_s24 }
  0x2c   :  { %2418 = vmatprep.subr.bf16.mxu0 %v2837_v0  ;;  %v64_v15 = vld [vmem:[%s3574_s3] sm:$0xff]  ;;  %v314_v16 = vld [vmem:[%s3571_s0 + $0x10] sm:$0xff]  ;;  %v315_v17 = vld [vmem:[%s3571_s0 + $0x18] sm:$0xff] }
  0x2d   :  { %v2948_v18 = vpack.c.bf16 %v64_v15, %v64_v15  ;;  %v332_v19 = vld [vmem:[%s3572_s1 + $0x20] sm:$0xff]  ;;  %v333_v20 = vld [vmem:[%s3572_s1 + $0x28] sm:$0xff]  ;;  %v334_v23 = vld [vmem:[%s3572_s1 + $0x30] sm:$0xff]  ;;  %p2810_p5 = por %p2809_p4, %p2808_p3 }
  0x2e   :  { %v316_v21 = vld [vmem:[%s3571_s0 + $0x20] sm:$0xff]  ;;  %v317_v22 = vld [vmem:[%s3571_s0 + $0x28] sm:$0xff]  ;;  %v335_v24 = vld [vmem:[%s3572_s1 + $0x38] sm:$0xff] }
  0x2f   :  { %2419 = vmatpush3.bf16.msra.mxu0 %v2652_v3  ;;  %455 = vperm.xlu1 %2649, %v329_v7   ;;  %v319_v25 = vld [vmem:[%s3571_s0 + $0x38] sm:$0xff]  ;;  %v337_v26 = vld [vmem:[%s3572_s1 + $0x48] sm:$0xff]  ;;  %v2112_v34 = vld [vmem:[%s3576_s5] ss:$0 sm:$0xff]  ;;  %v3017_v47 = vsel %vm582_vm1, %v2948_v18, 0  ;;  %p2811_p6 = pnand %p2810_p5, %p2804_p2 }
  0x30   :  { %2420 = vmatprep.subr.bf16.mxu0 %v2837_v0  ;;  %v321_v27 = vld [vmem:[%s3571_s0 + $0x48] sm:$0xff]  ;;  %v339_v28 = vld [vmem:[%s3572_s1 + $0x58] sm:$0xff]  ;;  %v2659_v41 = vld [vmem:[#allocation7 + $0x80] sm:$0xff]  }
  0x31   :  { %v323_v29 = vld [vmem:[%s3571_s0 + $0x58] sm:$0xff]  ;;  %v341_v30 = vld [vmem:[%s3572_s1 + $0x68] sm:$0xff]  ;;  %2437 = vmatpush3.bf16.msra.mxu1 %v2659_v41  ;;  %v2661_v43 = vld [vmem:[#allocation7 + $0x90] sm:$0xff]  }
  0x32   :  { %v325_v31 = vld [vmem:[%s3571_s0 + $0x68] sm:$0xff]  ;;  %v343_v32 = vld [vmem:[%s3572_s1 + $0x78] sm:$0xff]  ;;  %2438 = vmatprep.subr.bf16.mxu1 %v2837_v0  ;;  %v312_v44 = vld [vmem:[%s3571_s0] sm:$0xff] }
  0x33   :  { %2421 = vmatpush3.bf16.msra.mxu0 %v2653_v4  ;;  %351 = vperm.xlu1 %2649, %v313_v9   ;;  %v327_v33 = vld [vmem:[%s3571_s0 + $0x78] sm:$0xff]  ;;  %v2660_v42 = vld [vmem:[#allocation7 + $0x88] sm:$0xff]   ;;  %v318_v46 = vld [vmem:[%s3571_s0 + $0x30] sm:$0xff] }
  0x34   :  { %2422 = vmatprep.subr.bf16.mxu0 %v2837_v0  ;;  %v2662_v45 = vld [vmem:[#allocation7 + $0x98] sm:$0xff]   ;;  %v2663_v48 = vld [vmem:[#allocation7 + $0xa0] sm:$0xff]   ;;  %v2664_v50 = vld [vmem:[#allocation7 + $0xa8] sm:$0xff]  }
  0x35   :  { %2439 = vmatpush3.bf16.msra.mxu1 %v2660_v42  ;;  %v336_v49 = vld [vmem:[%s3572_s1 + $0x40] sm:$0xff]  ;;  %v2665_v52 = vld [vmem:[#allocation7 + $0xb0] sm:$0xff]   ;;  %v2666_v54 = vld [vmem:[#allocation7 + $0xb8] sm:$0xff]  }
  0x36   :  { %2440 = vmatprep.subr.bf16.mxu1 %v2837_v0  ;;  %v320_v51 = vld [vmem:[%s3571_s0 + $0x40] sm:$0xff]  ;;  %v338_v53 = vld [vmem:[%s3572_s1 + $0x50] sm:$0xff] }
  0x37   :  { %2423 = vmatpush3.bf16.msra.mxu0 %v2654_v6  ;;  %458 = vperm.xlu1 %2649, %v330_v11   ;;  %v322_v55 = vld [vmem:[%s3571_s0 + $0x50] sm:$0xff]  ;;  %v340_v56 = vld [vmem:[%s3572_s1 + $0x60] sm:$0xff] }
  0x38   :  { %2424 = vmatprep.subr.bf16.mxu0 %v2837_v0  ;;  %v324_v57 = vld [vmem:[%s3571_s0 + $0x60] sm:$0xff]  ;;  %v342_v58 = vld [vmem:[%s3572_s1 + $0x70] sm:$0xff] }
  0x39   :  { %2441 = vmatpush3.bf16.msra.mxu1 %v2661_v43  ;;  %v326_v60 = vld [vmem:[%s3571_s0 + $0x70] sm:$0xff]  ;;  %v2667_v1 = vld [vmem:[%s3577_s6 + $0x40] sm:$0xff]  }
  0x3a   :  { %2442 = vmatprep.subr.bf16.mxu1 %v2837_v0  ;;  %v2121_v42 = vld [vmem:[%s3576_s5 + $0x1] ss:$0 sm:$0xff] }
  0x3b   :  { %2425 = vmatpush3.bf16.msra.mxu0 %v2655_v8  ;;  %461 = vperm.xlu1 %2649, %v331_v13  }
  0x3c   :  { %2426 = vmatprep.subr.bf16.mxu0 %v2837_v0 }
  0x3d   :  { %2443 = vmatpush3.bf16.msra.mxu1 %v2662_v45  ;;  %v2122_v45 = vld [vmem:[%s3576_s5 + $0x2] ss:$0 sm:$0xff] }
  0x3e   :  { %2444 = vmatprep.subr.bf16.mxu1 %v2837_v0 }
  0x3f   :  { %2427 = vmatpush3.bf16.msra.mxu0 %v2656_v10  ;;  %354 = vperm.xlu1 %2649, %v314_v16  }
  0x40   :  { %2428 = vmatprep.subr.bf16.mxu0 %v2837_v0 }
  0x41   :  { %2445 = vmatpush3.bf16.msra.mxu1 %v2663_v48 }
  0x42   :  { %2446 = vmatprep.subr.bf16.mxu1 %v2837_v0 }
  0x43   :  { %2429 = vmatpush3.bf16.msra.mxu0 %v2657_v12  ;;  %357 = vperm.xlu1 %2649, %v315_v17  }
  0x44   :  { %2430 = vmatprep.subr.bf16.mxu0 %v2837_v0 }
  0x45   :  { %2447 = vmatpush3.bf16.msra.mxu1 %v2664_v50 }
  0x46   :  { %2448 = vmatprep.subr.bf16.mxu1 %v2837_v0 }
  0x47   :  { %2431 = vmatpush3.bf16.msra.mxu0 %v2658_v14  ;;  %464 = vperm.xlu1 %2649, %v332_v19   ;;  %v345_v14 = vlaneseq }
  0x48   :  { %2636 = vmatprep.subr.msk.bf16.mxu0 %vm582_vm1, %v2948_v18 }
  0x49   :  { %2449 = vmatpush3.bf16.msra.mxu1 %v2665_v52  ;;  %v3072_v19 = vand.u32 127, %v345_v14 }
  0x4a   :  { %2433 = vmatmul.mubr.bf16.vlgmr.msra.gmra.mrb[0].mxu0 %v2948_v18  ;;  %2450 = vmatprep.subr.bf16.mxu1 %v2837_v0 }
  0x4b   :  { %467 = vperm.xlu1 %2649, %v333_v20   ;;  %2457 = vmatpush3.bf16.msra.mxu0 %v3017_v47 }
  0x4c   :  { %2284 = vmatprep.subr.bf16.mxu0 %v2667_v1 }
  0x4d   :  { %2451 = vmatpush3.bf16.msra.mxu1 %v2666_v54 }
  0x4e   :  { %2637 = vmatprep.subr.msk.bf16.mxu1 %vm582_vm1, %v2948_v18 }
  0x4f   :  { %360 = vperm.xlu1 %2649, %v316_v21  }
  0x53   :  { %363 = vperm.xlu1 %2649, %v317_v22  }
  0x57   :  { %470 = vperm.xlu1 %2649, %v334_v23  }
  0x5b   :  { %473 = vperm.xlu1 %2649, %v335_v24  }
  0x5f   :  { %369 = vperm.xlu1 %2649, %v319_v25  }
  0x63   :  { %479 = vperm.xlu1 %2649, %v337_v26  }
  0x67   :  { %375 = vperm.xlu1 %2649, %v321_v27  }
  0x6b   :  { %485 = vperm.xlu1 %2649, %v339_v28  }
  0x6f   :  { %381 = vperm.xlu1 %2649, %v323_v29  }
  0x73   :  { %491 = vperm.xlu1 %2649, %v341_v30  }
  0x77   :  { %387 = vperm.xlu1 %2649, %v325_v31  }
  0x7b   :  { %497 = vperm.xlu1 %2649, %v343_v32   ;;  %v2668_v32 = vld [vmem:[%s3577_s6] sm:$0xff]  }
  0x7f   :  { %393 = vperm.xlu1 %2649, %v327_v33  }
  0xaa   :  { %v3047_v59 = vpop.permute.xlu1 %452 }
  0xab   :  { %vm499_vm12 = vcmp.eq.s32.totalorder %v3072_v19, %v3047_v59  ;;  %v2669_v59 = vld [vmem:[%s3577_s6 + $0x80] sm:$0xff]  }
  0xac   :  { %v2148_v54 = vsel %vm499_vm12, 1.0, %v2837_v0 }
  0xae   :  { %v3052_v61 = vpop.permute.xlu1 %455 }
  0xaf   :  { %vm500_vm13 = vcmp.eq.s32.totalorder %v3072_v19, %v3052_v61 }
  0xb2   :  { %v352_v62 = vpop.permute.xlu1 %351 }
  0xb3   :  { %vm396_vm2 = vcmp.eq.s32.totalorder %v3072_v19, %v352_v62 }
  0xb4   :  { %v2133_v24 = vsel %vm396_vm2, 1.0, %v2837_v0 }
  0xb6   :  { %v3054_v63 = vpop.permute.xlu1 %458 }
  0xb7   :  { %vm501_vm1 = vcmp.eq.s32.totalorder %v3072_v19, %v3054_v63 }
  0xba   :  { %v3059_v2 = vpop.permute.xlu1 %461 }
  0xbb   :  { %vm502_vm2 = vcmp.eq.s32.totalorder %v3072_v19, %v3059_v2  ;;  %v2150_v2 = vsel %vm501_vm1, 1.0, %v2837_v0 }
  0xbe   :  { %v355_v3 = vpop.permute.xlu1 %354 }
  0xbf   :  { %vm397_vm3 = vcmp.eq.s32.totalorder %v3072_v19, %v355_v3  ;;  %v2151_v3 = vsel %vm502_vm2, 1.0, %v2837_v0 }
  0xc0   :  { %v2134_v25 = vsel %vm397_vm3, 1.0, %v2837_v0 }
  0xc2   :  { %v358_v4 = vpop.permute.xlu1 %357 }
  0xc3   :  { %vm398_vm4 = vcmp.eq.s32.totalorder %v3072_v19, %v358_v4 }
  0xc4   :  { %v2135_v26 = vsel %vm398_vm4, 1.0, %v2837_v0 }
  0xc5   :  { %v444_v33 = vpack.c.bf16 %v2135_v26, %v2134_v25 }
  0xc6   :  { %v3061_v5 = vpop.permute.xlu1 %464 }
  0xc7   :  { %vm503_vm3 = vcmp.eq.s32.totalorder %v3072_v19, %v3061_v5 }
  0xc8   :  { %v2152_v5 = vsel %vm503_vm3, 1.0, %v2837_v0 }
  0xca   :  { %v3063_v6 = vpop.permute.xlu1 %467 }
  0xcb   :  { %vm504_vm4 = vcmp.eq.s32.totalorder %v3072_v19, %v3063_v6 }
  0xcc   :  { %v2153_v6 = vsel %vm504_vm4, 1.0, %v2837_v0 }
  0xce   :  { %v361_v7 = vpop.permute.xlu1 %360 }
  0xcf   :  { %vm399_vm5 = vcmp.eq.s32.totalorder %v3072_v19, %v361_v7 }
  0xd0   :  { %v2136_v27 = vsel %vm399_vm5, 1.0, %v2837_v0 }
  0xd2   :  { %v364_v8 = vpop.permute.xlu1 %363 }
  0xd3   :  { %vm400_vm6 = vcmp.eq.s32.totalorder %v3072_v19, %v364_v8  ;;  %v548_v8 = vpack.c.bf16 %v2151_v3, %v2150_v2  ;;  %v825_v2 = vld [vmem:[#allocation4 + $0x28] sm:$0xff] }
  0xd4   :  { %v2137_v28 = vsel %vm400_vm6, 1.0, %v2837_v0 }
  0xd6   :  { %v3065_v9 = vpop.permute.xlu1 %470 }
  0xda   :  { %v3067_v10 = vpop.permute.xlu1 %473 }
  0xde   :  { %v370_v11 = vpop.permute.xlu1 %369 }
  0xdf   :  { %vm402_vm10 = vcmp.eq.s32.totalorder %v3072_v19, %v370_v11 }
  0xe2   :  { %v3069_v15 = vpop.permute.xlu1 %479 }
  0xe3   :  { %vm508_vm12 = vcmp.eq.s32.totalorder %v3072_v19, %v3069_v15 }
  0xe6   :  { %v376_v21 = vpop.permute.xlu1 %375 }
  0xe7   :  { %vm404_vm11 = vcmp.eq.s32.totalorder %v3072_v19, %v376_v21 }
  0xea   :  { %v3085_v29 = vpop.permute.xlu1 %485 }
  0xeb   :  { %vm510_vm2 = vcmp.eq.s32.totalorder %v3072_v19, %v3085_v29 }
 0x11d   :  { %v169_v35 = vpop.f32.mrb[0].mxu0 }
 0x11e   :  { %v2999_v36 = vadd.f32 %v2112_v34, %v169_v35  ;;  %v2434_v37 = vpop.f32.mrb[1].mxu0  ;;  %v445_v35 = vpack.c.bf16 %v2137_v28, %v2136_v27 }
 0x11f   :  { %v172_v38 = vpop.f32.mrb[2].mxu0  ;;  %v382_v37 = vpop.permute.xlu1 %381 }
 0x120   :  { %177 = vadd.xlane.f32.xlu0 %v2999_v36  ;;  %v2435_v39 = vpop.f32.mrb[3].mxu0  ;;  %v180_v40 = vmul.f32 %v2999_v36, %v2999_v36  ;;  %vm406_vm15 = vcmp.eq.s32.totalorder %v3072_v19, %v382_v37 }
 0x121   :  { %v2143_v63 = vsel %vm406_vm15, 1.0, %v2837_v0 }
 0x123   :  { %v3114_v50 = vpop.permute.xlu1 %491 }
 0x124   :  { %181 = vadd.xlane.f32.xlu0 %v180_v40  ;;  %vm512_vm3 = vcmp.eq.s32.totalorder %v3072_v19, %v3114_v50  ;;  %v2683_v50 = vld [vmem:[%s3577_s6 + $0x28] sm:$0xff]  }
 0x127   :  { %v388_v61 = vpop.permute.xlu1 %387 }
 0x128   :  { %vm408_vm6 = vcmp.eq.s32.totalorder %v3072_v19, %v388_v61  ;;  %v822_v61 = vld [vmem:[#allocation4 + $0x10] sm:$0xff] }
 0x12b   :  { %v498_v11 = vpop.permute.xlu1 %497 }
 0x13a   :  { %348 = vperm.xlu0 %2650, %v312_v44   ;;  %v2139_v44 = vsel %vm402_vm10, 1.0, %v2837_v0 }
 0x13e   :  { %366 = vperm.xlu0 %2650, %v318_v46  }
 0x142   :  { %476 = vperm.xlu0 %2650, %v336_v49   ;;  %v2141_v49 = vsel %vm404_vm11, 1.0, %v2837_v0 }
 0x146   :  { %372 = vperm.xlu0 %2650, %v320_v51  }
 0x14a   :  { %482 = vperm.xlu0 %2650, %v338_v53  }
 0x14e   :  { %378 = vperm.xlu0 %2650, %v322_v55   ;;  %v2149_v55 = vsel %vm500_vm13, 1.0, %v2837_v0 }
 0x152   :  { %488 = vperm.xlu0 %2650, %v340_v56  }
 0x156   :  { %384 = vperm.xlu0 %2650, %v324_v57  }
 0x15a   :  { %494 = vperm.xlu0 %2650, %v342_v58  }
 0x15e   :  { %390 = vperm.xlu0 %2650, %v326_v60   ;;  %v547_v60 = vpack.c.bf16 %v2149_v55, %v2148_v54  ;;  %v2687_v54 = vld [vmem:[%s3577_s6 + $0xb0] sm:$0xff]   ;;  %v2688_v55 = vld [vmem:[%s3577_s6 + $0x78] sm:$0xff]  }
 0x1ad   :  { %v178_v12 = vpop.xlane.xlu0 %177 }
 0x1ae   :  { %v179_v13 = vmul.f32 0.03125, %v178_v12 }
 0x1b0   :  { %v184_v17 = vmul.f32 %v179_v13, %v179_v13  ;;  %v186_v38 = vsub.f32 %v2999_v36, %v179_v13  ;;  %v2145_v13 = vsel %vm408_vm6, 1.0, %v2837_v0 }
 0x1b1   :  { %v182_v16 = vpop.xlane.xlu0 %181 }
 0x1b2   :  { %v183_v18 = vmul.f32 0.03125, %v182_v16 }
 0x1b4   :  { %v185_v20 = vsub.f32 %v183_v18, %v184_v17  ;;  %v394_v18 = vpop.permute.xlu1 %393 }
 0x1b5   :  { %vm410_vm13 = vcmp.eq.s32.totalorder %v3072_v19, %v394_v18  ;;  %v835_v18 = vld [vmem:[#allocation4 + $0x78] sm:$0xff] }
 0x1b6   :  { %v187_v22 = vadd.f32 1e-05, %v185_v20  ;;  %v2147_v15 = vsel %vm410_vm13, 1.0, %v2837_v0 }
 0x1b8   :  { %2723 = vrsqrt.f32 %v187_v22 }
 0x1b9   :  { %v349_v23 = vpop.permute.xlu0 %348 }
 0x1ba   :  { %vm395_vm7 = vcmp.eq.s32.totalorder %v3072_v19, %v349_v23  ;;  %v2157_v23 = vsel %vm508_vm12, 1.0, %v2837_v0 }
 0x1bb   :  { %v2132_v30 = vsel %vm395_vm7, 1.0, %v2837_v0  ;;  %vm505_vm7 = vcmp.eq.s32.totalorder %v3072_v19, %v3065_v9 }
 0x1bc   :  { %v443_v31 = vpack.c.bf16 %v2133_v24, %v2132_v30  ;;  %v2154_v9 = vsel %vm505_vm7, 1.0, %v2837_v0 }
 0x1bd   :  { %v367_v34 = vpop.permute.xlu0 %366 }
 0x1be   :  { %2458 = vmatprep.mubr.msk.bf16.mxu0 %vm557_vm8, %v443_v31  ;;  %vm401_vm9 = vcmp.eq.s32.totalorder %v3072_v19, %v367_v34  ;;  %v2159_v31 = vsel %vm510_vm2, 1.0, %v2837_v0 }
 0x1bf   :  { %2459 = vmatmul.mubr.msk.bf16.vlgmr.msra.gmra.mrb[4].mxu0 %vm557_vm8, %v444_v33  ;;  %v2138_v41 = vsel %vm401_vm9, 1.0, %v2837_v0  ;;  %vm506_vm9 = vcmp.eq.s32.totalorder %v3072_v19, %v3067_v10 }
 0x1c0   :  { %2462 = vmatprep.mubr.msk.bf16.mxu0 %vm557_vm8, %v445_v35  ;;  %2285 = vmatpush3.bf16.msra.mxu0 %v2668_v32  ;;  %v446_v46 = vpack.c.bf16 %v2139_v44, %v2138_v41  ;;  %v2155_v17 = vsel %vm506_vm9, 1.0, %v2837_v0  ;;  %v2161_v32 = vsel %vm512_vm3, 1.0, %v2837_v0  ;;  %v2674_v41 = vld [vmem:[%s3577_s6 + $0x10] sm:$0xff]   ;;  %v2677_v44 = vld [vmem:[%s3577_s6 + $0x18] sm:$0xff]  }
 0x1c1   :  { %v3097_v39 = vpop.permute.xlu0 %476  ;;  %v550_v22 = vpack.c.bf16 %v2155_v17, %v2154_v9  ;;  %v833_v9 = vld [vmem:[#allocation4 + $0x68] sm:$0xff] }
 0x1c2   :  { %v2724_v40 = vpop.eup %2723  ;;  %vm507_vm10 = vcmp.eq.s32.totalorder %v3072_v19, %v3097_v39  ;;  %v2671_v39 = vld [vmem:[%s3577_s6 + $0x8] sm:$0xff]  }
 0x1c3   :  { %v189_v43 = vmul.f32 %v2724_v40, %v186_v38  ;;  %v2156_v20 = vsel %vm507_vm10, 1.0, %v2837_v0  ;;  %v2670_v38 = vld [vmem:[%s3577_s6 + $0x48] sm:$0xff]  }
 0x1c4   :  { %v551_v24 = vpack.c.bf16 %v2157_v23, %v2156_v20  ;;  %v2672_v40 = vld [vmem:[%s3577_s6 + $0x88] sm:$0xff]   ;;  %2286 = vmatprep.subr.bf16.mxu0 %v2670_v38 }
 0x1c5   :  { %v373_v36 = vpop.permute.xlu0 %372  ;;  %v194_v48 = vmul.f32 %v2121_v42, %v189_v43  ;;  %2287 = vmatpush3.bf16.msra.mxu0 %v2671_v39  ;;  %v2675_v42 = vld [vmem:[%s3577_s6 + $0x90] sm:$0xff]   ;;  %v2676_v43 = vld [vmem:[%s3577_s6 + $0x58] sm:$0xff]  }
 0x1c6   :  { %vm403_vm14 = vcmp.eq.s32.totalorder %v3072_v19, %v373_v36  ;;  %v2680_v36 = vld [vmem:[%s3577_s6 + $0x20] sm:$0xff]  }
 0x1c7   :  { %v2140_v51 = vsel %vm403_vm14, 1.0, %v2837_v0  ;;  %2463 = vmatmul.mubr.msk.bf16.gmra.mrb[8].mxu0 %vm557_vm8, %v446_v46  ;;  %v199_v52 = vadd.f32 %v2122_v45, %v194_v48  ;;  %v2678_v45 = vld [vmem:[%s3577_s6 + $0x98] sm:$0xff]   ;;  %v2679_v46 = vld [vmem:[%s3577_s6 + $0x60] sm:$0xff]  }
 0x1c8   :  { %v447_v53 = vpack.c.bf16 %v2141_v49, %v2140_v51  ;;  %v2681_v48 = vld [vmem:[%s3577_s6 + $0xa0] sm:$0xff]   ;;  %v2682_v49 = vld [vmem:[%s3577_s6 + $0x68] sm:$0xff]  }
 0x1c9   :  { %v3120_v56 = vpop.permute.xlu0 %482  ;;  %v200_v57 = vmax.f32 %v199_v52, 0.0  ;;  %v2684_v51 = vld [vmem:[%s3577_s6 + $0xa8] sm:$0xff]   ;;  %v2685_v52 = vld [vmem:[%s3577_s6 + $0x70] sm:$0xff]  }
 0x1ca   :  { %2466 = vmatprep.mubr.msk.bf16.mxu0 %vm557_vm8, %v447_v53  ;;  %vm509_vm14 = vcmp.eq.s32.totalorder %v3072_v19, %v3120_v56  ;;  %v2686_v53 = vld [vmem:[%s3577_s6 + $0x30] sm:$0xff]   ;;  %v2689_v56 = vld [vmem:[%s3577_s6 + $0x38] sm:$0xff]  }
 0x1cb   :  { %v201_v58 = vpack.c.bf16 %v200_v57, %v200_v57  ;;  %v2158_v27 = vsel %vm509_vm14, 1.0, %v2837_v0  ;;  %v2690_v57 = vld [vmem:[%s3577_s6 + $0xb8] sm:$0xff]  }
 0x1cc   :  { %v552_v33 = vpack.c.bf16 %v2159_v31, %v2158_v27 }
 0x1cd   :  { %2453 = vmatmul.mubr.bf16.vlgmr.msra.gmra.mrb[0].mxu1 %v201_v58  ;;  %v379_v62 = vpop.permute.xlu0 %378  ;;  %v820_v58 = vld [vmem:[#allocation4] sm:$0xff] }
 0x1ce   :  { %vm405_vm5 = vcmp.eq.s32.totalorder %v3072_v19, %v379_v62  ;;  %2476 = vmatprep.mubr.msk.bf16.mxu1 %vm557_vm8, %v547_v60  ;;  %2475 = vmatpush3.bf16.msra.mxu1 %v3017_v47  ;;  %v549_v47 = vpack.c.bf16 %v2153_v6, %v2152_v5  ;;  %v823_v62 = vld [vmem:[#allocation4 + $0x18] sm:$0xff] }
 0x1cf   :  { %v2142_v1 = vsel %vm405_vm5, 1.0, %v2837_v0  ;;  %2492 = vmatprep.subr.bf16.mxu1 %v2669_v59  ;;  %vm514_vm5 = vcmp.eq.s32.totalorder %v3072_v19, %v498_v11  ;;  %v827_v5 = vld [vmem:[#allocation4 + $0x38] sm:$0xff] }
 0x1d0   :  { %v448_v4 = vpack.c.bf16 %v2143_v63, %v2142_v1  ;;  %v2163_v35 = vsel %vm514_vm5, 1.0, %v2837_v0  ;;  %v837_v63 = vpack.c.bf16 %v823_v62, %v822_v61  ;;  %v824_v1 = vld [vmem:[#allocation4 + $0x20] sm:$0xff] }
 0x1d1   :  { %v489_v7 = vpop.permute.xlu0 %488  ;;  %v838_v3 = vpack.c.bf16 %v825_v2, %v824_v1 }
 0x1d2   :  { %2467 = vmatmul.mubr.msk.bf16.gmra.mrb[12].mxu0 %vm557_vm8, %v448_v4  ;;  %vm511_vm15 = vcmp.eq.s32.totalorder %v3072_v19, %v489_v7  ;;  %v826_v4 = vld [vmem:[#allocation4 + $0x30] sm:$0xff]  ;;  %v828_v7 = vld [vmem:[#allocation4 + $0x40] sm:$0xff] }
 0x1d3   :  { %v2160_v30 = vsel %vm511_vm15, 1.0, %v2837_v0  ;;  %v839_v6 = vpack.c.bf16 %v827_v5, %v826_v4 }
 0x1d4   :  { %v553_v29 = vpack.c.bf16 %v2161_v32, %v2160_v30 }
 0x1d5   :  { %2477 = vmatmul.mubr.msk.bf16.vlgmr.msra.gmra.mrb[4].mxu1 %vm557_vm8, %v548_v8  ;;  %v385_v12 = vpop.permute.xlu0 %384  ;;  %v829_v8 = vld [vmem:[#allocation4 + $0x48] sm:$0xff] }
 0x1d6   :  { %vm407_vm11 = vcmp.eq.s32.totalorder %v3072_v19, %v385_v12  ;;  %2480 = vmatprep.mubr.msk.bf16.mxu1 %vm557_vm8, %v549_v47  ;;  %2493 = vmatpush3.bf16.msra.mxu1 %v2669_v59  ;;  %v821_v59 = vld [vmem:[#allocation4 + $0x8] sm:$0xff]  ;;  %v840_v11 = vpack.c.bf16 %v829_v8, %v828_v7  ;;  %v830_v47 = vld [vmem:[#allocation4 + $0x50] sm:$0xff]  ;;  %v831_v12 = vld [vmem:[#allocation4 + $0x58] sm:$0xff] }
 0x1d7   :  { %v2144_v16 = vsel %vm407_vm11, 1.0, %v2837_v0  ;;  %2494 = vmatprep.subr.bf16.mxu1 %v2672_v40  ;;  %v836_v60 = vpack.c.bf16 %v821_v59, %v820_v58 }
 0x1d8   :  { %v449_v10 = vpack.c.bf16 %v2145_v13, %v2144_v16  ;;  %v841_v13 = vpack.c.bf16 %v831_v12, %v830_v47  ;;  %v832_v16 = vld [vmem:[#allocation4 + $0x60] sm:$0xff] }
 0x1d9   :  { %v495_v21 = vpop.permute.xlu0 %494  ;;  %v842_v17 = vpack.c.bf16 %v833_v9, %v832_v16 }
 0x1da   :  { %2470 = vmatprep.mubr.msk.bf16.mxu0 %vm557_vm8, %v449_v10  ;;  %vm513_vm4 = vcmp.eq.s32.totalorder %v3072_v19, %v495_v21  ;;  %2495 = vmatpush3.bf16.msra.mxu1 %v2672_v40  ;;  %v834_v10 = vld [vmem:[#allocation4 + $0x70] sm:$0xff] }
 0x1db   :  { %v2162_v34 = vsel %vm513_vm4, 1.0, %v2837_v0  ;;  %2496 = vmatprep.subr.bf16.mxu1 %v2675_v42  ;;  %v843_v20 = vpack.c.bf16 %v835_v18, %v834_v10 }
 0x1dc   :  { %v554_v37 = vpack.c.bf16 %v2163_v35, %v2162_v34 }
 0x1dd   :  { %2481 = vmatmul.mubr.msk.bf16.gmra.mrb[8].mxu1 %vm557_vm8, %v550_v22  ;;  %v391_v25 = vpop.permute.xlu0 %390 }
 0x1de   :  { %vm409_vm1 = vcmp.eq.s32.totalorder %v3072_v19, %v391_v25  ;;  %2484 = vmatprep.mubr.msk.bf16.mxu1 %vm557_vm8, %v551_v24  ;;  %v2673_v19 = vld [vmem:[%s3577_s6 + $0x50] sm:$0xff]   ;;  %2497 = vmatpush3.bf16.msra.mxu1 %v2675_v42 }
 0x1df   :  { %v2146_v26 = vsel %vm409_vm1, 1.0, %v2837_v0  ;;  %2288 = vmatprep.subr.bf16.mxu0 %v2673_v19  ;;  %2498 = vmatprep.subr.bf16.mxu1 %v2678_v45 }
 0x1e0   :  { %v450_v28 = vpack.c.bf16 %v2147_v15, %v2146_v26  ;;  %2289 = vmatpush3.bf16.msra.mxu0 %v2674_v41 }
 0x1e1   :  { %2290 = vmatprep.subr.bf16.mxu0 %v2676_v43 }
 0x1e2   :  { %2471 = vmatmul.mubr.msk.bf16.gmra.mrb[16].mxu0 %vm557_vm8, %v450_v28  ;;  %2499 = vmatpush3.bf16.msra.mxu1 %v2678_v45 }
 0x1e3   :  { %2500 = vmatprep.subr.bf16.mxu1 %v2681_v48 }
 0x1e4   :  { %2291 = vmatpush3.bf16.msra.mxu0 %v2677_v44 }
 0x1e5   :  { %2485 = vmatmul.mubr.msk.bf16.gmra.mrb[12].mxu1 %vm557_vm8, %v552_v33  ;;  %2292 = vmatprep.subr.bf16.mxu0 %v2679_v46 }
 0x1e6   :  { %2488 = vmatprep.mubr.msk.bf16.mxu1 %vm557_vm8, %v553_v29  ;;  %2501 = vmatpush3.bf16.msra.mxu1 %v2681_v48 }
 0x1e7   :  { %2502 = vmatprep.subr.bf16.mxu1 %v2684_v51 }
 0x1e8   :  { %2293 = vmatpush3.bf16.msra.mxu0 %v2680_v36 }
 0x1e9   :  { %2294 = vmatprep.subr.bf16.mxu0 %v2682_v49 }
 0x1ea   :  { %2503 = vmatpush3.bf16.msra.mxu1 %v2684_v51 }
 0x1eb   :  { %2504 = vmatprep.subr.bf16.mxu1 %v2687_v54 }
 0x1ec   :  { %2295 = vmatpush3.bf16.msra.mxu0 %v2683_v50 }
 0x1ed   :  { %2489 = vmatmul.mubr.msk.bf16.gmra.mrb[16].mxu1 %vm557_vm8, %v554_v37  ;;  %2296 = vmatprep.subr.bf16.mxu0 %v2685_v52 }
 0x1ee   :  { %2505 = vmatpush3.bf16.msra.mxu1 %v2687_v54  ;;  %2508 = vmatprep.mubr.bf16.mxu1 %v836_v60 }
 0x1ef   :  { %2506 = vmatprep.subr.bf16.mxu1 %v2690_v57 }
 0x1f0   :  { %2297 = vmatpush3.bf16.msra.mxu0 %v2686_v53 }
 0x1f1   :  { %2298 = vmatprep.subr.bf16.mxu0 %v2688_v55 }
 0x1f2   :  { %2507 = vmatpush3.bf16.msra.mxu1 %v2690_v57 }
 0x1f4   :  { %2299 = vmatpush3.bf16.msra.mxu0 %v2689_v56 }
 0x1f5   :  { %2556 = vmatprep.subr.bf16.mxu0 %v2837_v0  ;;  %2509 = vmatmul.mubr.bf16.vlgmr.msra.gmra.mrb[20].mxu1 %v837_v63 }
 0x1f6   :  { %2512 = vmatprep.mubr.bf16.mxu1 %v838_v3 }
 0x1fd   :  { %2513 = vmatmul.mubr.bf16.gmra.mrb[24].mxu1 %v839_v6 }
 0x1fe   :  { %2516 = vmatprep.mubr.bf16.mxu1 %v840_v11 }
 0x205   :  { %2517 = vmatmul.mubr.bf16.gmra.mrb[28].mxu1 %v841_v13 }
 0x206   :  { %2520 = vmatprep.mubr.bf16.mxu1 %v842_v17 }
 0x20d   :  { %2521 = vmatmul.mubr.bf16.gmra.mrb[32].mxu1 %v843_v20 }
 0x292   :  { %v2460_v21 = vpop.f32.mrb[4].mxu0 }
 0x293   :  { %v620_v22 = vpop.f32.mrb[5].mxu0 }
 0x294   :  { %v2461_v23 = vpop.f32.mrb[6].mxu0 }
 0x295   :  { %v805_v24 = vpack.c.bf16 %v2461_v23, %v2460_v21  ;;  %v623_v25 = vpop.f32.mrb[7].mxu0 }
 0x296   :  { %v804_v15 = vpack.c.bf16 %v623_v25, %v620_v22 }
 0x29a   :  { %v2464_v26 = vpop.f32.mrb[8].mxu0 }
 0x29b   :  { %v636_v27 = vpop.f32.mrb[9].mxu0 }
 0x29c   :  { %v2465_v28 = vpop.f32.mrb[10].mxu0 }
 0x29d   :  { %v807_v30 = vpack.c.bf16 %v2465_v28, %v2464_v26  ;;  %v639_v31 = vpop.f32.mrb[11].mxu0  ;;  %v3280_v28 = vld [vmem:[%s3576_s5 + $0x4] ss:$0 sm:$0xff] }
 0x29e   :  { %v806_v32 = vpack.c.bf16 %v639_v31, %v636_v27 }
 0x2a0   :  { %v3253_v33 = vpop.f32.mrb[0].mxu1 }
 0x2a1   :  { %v2454_v29 = vpop.f32.mrb[1].mxu1 }
 0x2a2   :  { %v308_v34 = vpop.f32.mrb[2].mxu1 }
 0x2a3   :  { %v2455_v35 = vpop.f32.mrb[3].mxu1 }
 0x2a5   :  { %v2468_v37 = vpop.f32.mrb[12].mxu0 }
 0x2a6   :  { %v652_v38 = vpop.f32.mrb[13].mxu0 }
 0x2a7   :  { %v2469_v39 = vpop.f32.mrb[14].mxu0 }
 0x2a8   :  { %v809_v40 = vpack.c.bf16 %v2469_v39, %v2468_v37  ;;  %v655_v19 = vpop.f32.mrb[15].mxu0  ;;  %v2478_v41 = vpop.f32.mrb[4].mxu1 }
 0x2a9   :  { %v808_v42 = vpack.c.bf16 %v655_v19, %v652_v38  ;;  %v741_v43 = vpop.f32.mrb[5].mxu1 }
 0x2aa   :  { %v2479_v44 = vpop.f32.mrb[6].mxu1 }
 0x2ab   :  { %v813_v45 = vpack.c.bf16 %v2479_v44, %v2478_v41  ;;  %v744_v46 = vpop.f32.mrb[7].mxu1 }
 0x2ac   :  { %v812_v36 = vpack.c.bf16 %v744_v46, %v741_v43 }
 0x2ae   :  { %1073 = vmatprep.mubr.bf16.mxu0 %v812_v36 }
 0x2af   :  { %1074 = vmatmul.mubr.bf16.vlgmr.msra.gmra.mrb[20].mxu0 %v804_v15 }
 0x2b0   :  { %v2482_v48 = vpop.f32.mrb[8].mxu1  ;;  %1081 = vmatprep.mubr.bf16.mxu0 %v813_v45 }
 0x2b1   :  { %v757_v49 = vpop.f32.mrb[9].mxu1 }
 0x2b2   :  { %v2483_v50 = vpop.f32.mrb[10].mxu1 }
 0x2b3   :  { %v815_v51 = vpack.c.bf16 %v2483_v50, %v2482_v48  ;;  %v760_v52 = vpop.f32.mrb[11].mxu1 }
 0x2b4   :  { %v814_v53 = vpack.c.bf16 %v760_v52, %v757_v49 }
 0x2b5   :  { %v2472_v54 = vpop.f32.mrb[16].mxu0 }
 0x2b6   :  { %v668_v55 = vpop.f32.mrb[17].mxu0 }
 0x2b7   :  { %v2473_v56 = vpop.f32.mrb[18].mxu0  ;;  %1082 = vmatmul.mubr.bf16.gmra.mrb[24].mxu0 %v805_v24 }
 0x2b8   :  { %v811_v57 = vpack.c.bf16 %v2473_v56, %v2472_v54  ;;  %v671_v58 = vpop.f32.mrb[19].mxu0  ;;  %v2486_v59 = vpop.f32.mrb[12].mxu1  ;;  %1089 = vmatprep.mubr.bf16.mxu0 %v814_v53 }
 0x2b9   :  { %v810_v60 = vpack.c.bf16 %v671_v58, %v668_v55  ;;  %v773_v61 = vpop.f32.mrb[13].mxu1 }
 0x2ba   :  { %v2487_v62 = vpop.f32.mrb[14].mxu1 }
 0x2bb   :  { %v817_v63 = vpack.c.bf16 %v2487_v62, %v2486_v59  ;;  %v776_v1 = vpop.f32.mrb[15].mxu1 }
 0x2bc   :  { %v816_v2 = vpack.c.bf16 %v776_v1, %v773_v61 }
 0x2bf   :  { %1090 = vmatmul.mubr.bf16.gmra.mrb[28].mxu0 %v806_v32 }
 0x2c0   :  { %v2490_v3 = vpop.f32.mrb[16].mxu1  ;;  %1097 = vmatprep.mubr.bf16.mxu0 %v815_v51 }
 0x2c1   :  { %v789_v4 = vpop.f32.mrb[17].mxu1 }
 0x2c2   :  { %v2491_v5 = vpop.f32.mrb[18].mxu1 }
 0x2c3   :  { %v819_v6 = vpack.c.bf16 %v2491_v5, %v2490_v3  ;;  %v792_v7 = vpop.f32.mrb[19].mxu1 }
 0x2c4   :  { %v818_v8 = vpack.c.bf16 %v792_v7, %v789_v4 }
 0x2c7   :  { %1098 = vmatmul.mubr.bf16.gmra.mrb[32].mxu0 %v807_v30 }
 0x2c8   :  { %1105 = vmatprep.mubr.bf16.mxu0 %v816_v2  ;;  %v2510_v11 = vpop.f32.mrb[20].mxu1 }
 0x2c9   :  { %v1172_v47 = vpop.f32.mrb[21].mxu1 }
 0x2ca   :  { %v2511_v12 = vpop.f32.mrb[22].mxu1 }
 0x2cb   :  { %v1175_v13 = vpop.f32.mrb[23].mxu1 }
 0x2cf   :  { %1106 = vmatmul.mubr.bf16.gmra.mrb[36].mxu0 %v808_v42 }
 0x2d0   :  { %1113 = vmatprep.mubr.bf16.mxu0 %v817_v63  ;;  %v3257_v16 = vpop.f32.mrb[24].mxu1 }
 0x2d1   :  { %v1188_v9 = vpop.f32.mrb[25].mxu1 }
 0x2d2   :  { %v3259_v17 = vpop.f32.mrb[26].mxu1 }
 0x2d3   :  { %v1191_v10 = vpop.f32.mrb[27].mxu1 }
 0x2d7   :  { %1114 = vmatmul.mubr.bf16.gmra.mrb[40].mxu0 %v809_v40 }
 0x2d8   :  { %1121 = vmatprep.mubr.bf16.mxu0 %v818_v8  ;;  %v3261_v18 = vpop.f32.mrb[28].mxu1 }
 0x2d9   :  { %v3263_v20 = vpop.f32.mrb[29].mxu1 }
 0x2da   :  { %v3265_v21 = vpop.f32.mrb[30].mxu1 }
 0x2db   :  { %v3267_v22 = vpop.f32.mrb[31].mxu1 }
 0x2df   :  { %1122 = vmatmul.mubr.bf16.gmra.mrb[44].mxu0 %v810_v60 }
 0x2e0   :  { %1129 = vmatprep.mubr.bf16.mxu0 %v819_v6  ;;  %v3269_v23 = vpop.f32.mrb[32].mxu1 }
 0x2e1   :  { %v3271_v24 = vpop.f32.mrb[33].mxu1 }
 0x2e2   :  { %v3273_v25 = vpop.f32.mrb[34].mxu1 }
 0x2e3   :  { %v3275_v15 = vpop.f32.mrb[35].mxu1 }
 0x2e7   :  { %1130 = vmatmul.mubr.bf16.gmra.mrb[48].mxu0 %v811_v57 }
 0x2e8   :  { %2572 = vmatprep.mubr.msk.bf16.mxu0 %vm2838_vm0, %v2837_v0 }
 0x382   :  { %v2300_v26 = vpop.f32.mrb[20].mxu0 }
 0x383   :  { %v2301_v27 = vpop.f32.mrb[21].mxu0 }
 0x384   :  { %v2302_v30 = vadd.f32 %v2301_v27, %v2300_v26  ;;  %v2303_v31 = vpop.f32.mrb[22].mxu0 }
 0x385   :  { %v2304_v32 = vpop.f32.mrb[23].mxu0 }
 0x386   :  { %v1076_v29 = vadd.f32 %v2302_v30, %v3280_v28  ;;  %v2305_v34 = vadd.f32 %v2304_v32, %v2303_v31  ;;  %v2692_v32 = vld [vmem:[#allocation7 + $0x48] sm:$0xff]  }
 0x388   :  { %v3283_v35 = vadd.f32 %v1172_v47, %v1076_v29  ;;  %v1079_v37 = vadd.f32 %v2305_v34, %v3280_v28 }
 0x38a   :  { %v3286_v38 = vadd.f32 %v1175_v13, %v1079_v37  ;;  %v2306_v39 = vpop.f32.mrb[24].mxu0  ;;  %1237 = vadd.xlane.f32.xlu0 %v3283_v35  ;;  %v1285_v46 = vmul.f32 %v3283_v35, %v3283_v35  ;;  %v2691_v13 = vld [vmem:[#allocation7 + $0x40] sm:$0xff]  }
 0x38b   :  { %v2307_v40 = vpop.f32.mrb[25].mxu0  ;;  %2524 = vmatprep.subr.bf16.mxu1 %v2691_v13 }
 0x38c   :  { %v2308_v19 = vadd.f32 %v2307_v40, %v2306_v39  ;;  %v2309_v41 = vpop.f32.mrb[26].mxu0  ;;  %1239 = vadd.xlane.f32.xlu1 %v3286_v38  ;;  %v1286_v42 = vmul.f32 %v3286_v38, %v3286_v38  ;;  %2525 = vmatpush3.bf16.msra.mxu1 %v2691_v13  ;;  %v2693_v40 = vld [vmem:[#allocation7 + $0x50] sm:$0xff]  }
 0x38d   :  { %v2310_v43 = vpop.f32.mrb[27].mxu0  ;;  %2526 = vmatprep.subr.bf16.mxu1 %v2692_v32 }
 0x38e   :  { %v1084_v44 = vadd.f32 %v2308_v19, %v3280_v28  ;;  %v2311_v45 = vadd.f32 %v2310_v43, %v2309_v41  ;;  %1303 = vadd.xlane.f32.xlu0 %v1286_v42 }
 0x390   :  { %v1087_v36 = vadd.f32 %v2311_v45, %v3280_v28  ;;  %1301 = vadd.xlane.f32.xlu1 %v1285_v46  ;;  %v3296_v48 = vadd.f32 %v2510_v11, %v1084_v44  ;;  %2527 = vmatpush3.bf16.msra.mxu1 %v2692_v32 }
 0x391   :  { %2528 = vmatprep.subr.bf16.mxu1 %v2693_v40 }
 0x392   :  { %v2312_v49 = vpop.f32.mrb[28].mxu0  ;;  %1241 = vadd.xlane.f32.xlu0 %v3296_v48  ;;  %v1287_v50 = vmul.f32 %v3296_v48, %v3296_v48  ;;  %v3301_v51 = vadd.f32 %v2511_v12, %v1087_v36 }
 0x393   :  { %v2313_v52 = vpop.f32.mrb[29].mxu0 }
 0x394   :  { %v2314_v53 = vadd.f32 %v2313_v52, %v2312_v49  ;;  %v2315_v54 = vpop.f32.mrb[30].mxu0  ;;  %1305 = vadd.xlane.f32.xlu1 %v1287_v50  ;;  %v1288_v60 = vmul.f32 %v3301_v51, %v3301_v51  ;;  %2529 = vmatpush3.bf16.msra.mxu1 %v2693_v40 }
 0x395   :  { %v2316_v55 = vpop.f32.mrb[31].mxu0 }
 0x396   :  { %v2317_v56 = vadd.f32 %v2316_v55, %v2315_v54  ;;  %v1092_v57 = vadd.f32 %v2314_v53, %v3280_v28  ;;  %1243 = vadd.xlane.f32.xlu0 %v3301_v51  ;;  %v2695_v53 = vld [vmem:[#allocation7 + $0x60] sm:$0xff]  }
 0x398   :  { %v3305_v58 = vadd.f32 %v1188_v9, %v1092_v57  ;;  %v1095_v59 = vadd.f32 %v2317_v56, %v3280_v28 }
 0x39a   :  { %v3310_v61 = vadd.f32 %v1191_v10, %v1095_v59  ;;  %v2318_v62 = vpop.f32.mrb[32].mxu0  ;;  %1307 = vadd.xlane.f32.xlu0 %v1288_v60  ;;  %1245 = vadd.xlane.f32.xlu1 %v3305_v58  ;;  %v1289_v3 = vmul.f32 %v3305_v58, %v3305_v58 }
 0x39b   :  { %v2319_v63 = vpop.f32.mrb[33].mxu0 }
 0x39c   :  { %v2320_v1 = vadd.f32 %v2319_v63, %v2318_v62  ;;  %v2321_v2 = vpop.f32.mrb[34].mxu0  ;;  %v1290_v8 = vmul.f32 %v3310_v61, %v3310_v61  ;;  %v2696_v62 = vld [vmem:[#allocation7 + $0x68] sm:$0xff]  }
 0x39d   :  { %v2322_v4 = vpop.f32.mrb[35].mxu0 }
 0x39e   :  { %v1100_v5 = vadd.f32 %v2320_v1, %v3280_v28  ;;  %v2323_v6 = vadd.f32 %v2322_v4, %v2321_v2  ;;  %1247 = vadd.xlane.f32.xlu0 %v3310_v61  ;;  %1309 = vadd.xlane.f32.xlu1 %v1289_v3  ;;  %v2697_v4 = vld [vmem:[#allocation7 + $0x70] sm:$0xff]  }
 0x3a0   :  { %v1103_v7 = vadd.f32 %v2323_v6, %v3280_v28  ;;  %v3321_v11 = vadd.f32 %v3257_v16, %v1100_v5 }
 0x3a2   :  { %v2324_v47 = vpop.f32.mrb[36].mxu0  ;;  %1311 = vadd.xlane.f32.xlu0 %v1290_v8  ;;  %1249 = vadd.xlane.f32.xlu1 %v3321_v11  ;;  %v3325_v12 = vadd.f32 %v3259_v17, %v1103_v7  ;;  %v1291_v27 = vmul.f32 %v3321_v11, %v3321_v11 }
 0x3a3   :  { %v2325_v9 = vpop.f32.mrb[37].mxu0 }
 0x3a4   :  { %v2326_v10 = vadd.f32 %v2325_v9, %v2324_v47  ;;  %v2327_v26 = vpop.f32.mrb[38].mxu0  ;;  %v1292_v34 = vmul.f32 %v3325_v12, %v3325_v12 }
 0x3a5   :  { %v2328_v30 = vpop.f32.mrb[39].mxu0 }
 0x3a6   :  { %v2329_v31 = vadd.f32 %v2328_v30, %v2327_v26  ;;  %v1108_v16 = vadd.f32 %v2326_v10, %v3280_v28  ;;  %1251 = vadd.xlane.f32.xlu0 %v3325_v12  ;;  %1313 = vadd.xlane.f32.xlu1 %v1291_v27 }
 0x3a8   :  { %v3332_v17 = vadd.f32 %v3263_v20, %v1108_v16  ;;  %v1111_v29 = vadd.f32 %v2329_v31, %v3280_v28 }
 0x3aa   :  { %v3338_v37 = vadd.f32 %v3267_v22, %v1111_v29  ;;  %v2330_v39 = vpop.f32.mrb[40].mxu0  ;;  %1315 = vadd.xlane.f32.xlu0 %v1292_v34  ;;  %1253 = vadd.xlane.f32.xlu1 %v3332_v17  ;;  %v1293_v20 = vmul.f32 %v3332_v17, %v3332_v17  ;;  %v2694_v22 = vld [vmem:[#allocation7 + $0x58] sm:$0xff]  }
 0x3ab   :  { %v2331_v19 = vpop.f32.mrb[41].mxu0  ;;  %2530 = vmatprep.subr.bf16.mxu1 %v2694_v22 }
 0x3ac   :  { %v2332_v41 = vadd.f32 %v2331_v19, %v2330_v39  ;;  %v2333_v42 = vpop.f32.mrb[42].mxu0  ;;  %v1294_v36 = vmul.f32 %v3338_v37, %v3338_v37  ;;  %2531 = vmatpush3.bf16.msra.mxu1 %v2694_v22 }
 0x3ad   :  { %v2334_v43 = vpop.f32.mrb[43].mxu0  ;;  %2532 = vmatprep.subr.bf16.mxu1 %v2695_v53 }
 0x3ae   :  { %v1116_v44 = vadd.f32 %v2332_v41, %v3280_v28  ;;  %v2335_v45 = vadd.f32 %v2334_v43, %v2333_v42  ;;  %1255 = vadd.xlane.f32.xlu0 %v3338_v37  ;;  %1317 = vadd.xlane.f32.xlu1 %v1293_v20 }
 0x3b0   :  { %v1119_v46 = vadd.f32 %v2335_v45, %v3280_v28  ;;  %v3349_v49 = vadd.f32 %v3261_v18, %v1116_v44  ;;  %2533 = vmatpush3.bf16.msra.mxu1 %v2695_v53 }
 0x3b1   :  { %2534 = vmatprep.subr.bf16.mxu1 %v2696_v62 }
 0x3b2   :  { %1319 = vadd.xlane.f32.xlu0 %v1294_v36  ;;  %1257 = vadd.xlane.f32.xlu1 %v3349_v49  ;;  %v2336_v50 = vpop.f32.mrb[44].mxu0  ;;  %v3353_v52 = vadd.f32 %v3265_v21, %v1119_v46  ;;  %v1295_v57 = vmul.f32 %v3349_v49, %v3349_v49 }
 0x3b3   :  { %v2337_v54 = vpop.f32.mrb[45].mxu0 }
 0x3b4   :  { %v2338_v55 = vadd.f32 %v2337_v54, %v2336_v50  ;;  %v2339_v56 = vpop.f32.mrb[46].mxu0  ;;  %v1296_v1 = vmul.f32 %v3353_v52, %v3353_v52  ;;  %2535 = vmatpush3.bf16.msra.mxu1 %v2696_v62 }
 0x3b5   :  { %v2340_v59 = vpop.f32.mrb[47].mxu0  ;;  %2536 = vmatprep.subr.bf16.mxu1 %v2697_v4 }
 0x3b6   :  { %v2341_v18 = vadd.f32 %v2340_v59, %v2339_v56  ;;  %v1124_v60 = vadd.f32 %v2338_v55, %v3280_v28  ;;  %1259 = vadd.xlane.f32.xlu0 %v3353_v52  ;;  %1321 = vadd.xlane.f32.xlu1 %v1295_v57 }
 0x3b8   :  { %v3360_v21 = vadd.f32 %v3271_v24, %v1124_v60  ;;  %v1127_v63 = vadd.f32 %v2341_v18, %v3280_v28  ;;  %2537 = vmatpush3.bf16.msra.mxu1 %v2697_v4 }
 0x3ba   :  { %v3366_v2 = vadd.f32 %v3275_v15, %v1127_v63  ;;  %1323 = vadd.xlane.f32.xlu0 %v1296_v1  ;;  %v2342_v3 = vpop.f32.mrb[48].mxu0  ;;  %1261 = vadd.xlane.f32.xlu1 %v3360_v21  ;;  %v1297_v24 = vmul.f32 %v3360_v21, %v3360_v21  ;;  %v2698_v15 = vld [vmem:[#allocation7 + $0x78] sm:$0xff]  }
 0x3bb   :  { %v2343_v5 = vpop.f32.mrb[49].mxu0  ;;  %2538 = vmatprep.subr.bf16.mxu1 %v2698_v15 }
 0x3bc   :  { %v2344_v6 = vadd.f32 %v2343_v5, %v2342_v3  ;;  %v2345_v7 = vpop.f32.mrb[50].mxu0  ;;  %v1298_v10 = vmul.f32 %v3366_v2, %v3366_v2  ;;  %2539 = vmatpush3.bf16.msra.mxu1 %v2698_v15 }
 0x3bd   :  { %v2346_v8 = vpop.f32.mrb[51].mxu0  ;;  %2576 = vmatprep.subr.bf16.mxu1 %v2837_v0 }
 0x3be   :  { %v1132_v47 = vadd.f32 %v2344_v6, %v3280_v28  ;;  %v2347_v13 = vadd.f32 %v2346_v8, %v2345_v7  ;;  %1263 = vadd.xlane.f32.xlu0 %v3366_v2  ;;  %1325 = vadd.xlane.f32.xlu1 %v1297_v24  ;;  %v3399_v8 = vld [vmem:[%s3576_s5 + $0x5] ss:$0 sm:$0xff] }
 0x3c0   :  { %v1135_v9 = vadd.f32 %v2347_v13, %v3280_v28  ;;  %v3377_v26 = vadd.f32 %v3269_v23, %v1132_v47 }
 0x3c2   :  { %1327 = vadd.xlane.f32.xlu0 %v1298_v10  ;;  %1265 = vadd.xlane.f32.xlu1 %v3377_v26  ;;  %v3381_v27 = vadd.f32 %v3273_v25, %v1135_v9  ;;  %v1299_v30 = vmul.f32 %v3377_v26, %v3377_v26  ;;  %v3405_v9 = vld [vmem:[%s3576_s5 + $0x6] ss:$0 sm:$0xff] }
 0x3c4   :  { %v1300_v23 = vmul.f32 %v3381_v27, %v3381_v27 }
 0x3c6   :  { %1267 = vadd.xlane.f32.xlu0 %v3381_v27  ;;  %1329 = vadd.xlane.f32.xlu1 %v1299_v30 }
 0x3ca   :  { %1331 = vadd.xlane.f32.xlu0 %v1300_v23 }
 0x417   :  { %v1238_v28 = vpop.xlane.xlu0 %1237 }
 0x418   :  { %v1269_v16 = vmul.f32 0.03125, %v1238_v28 }
 0x419   :  { %v1240_v31 = vpop.xlane.xlu1 %1239 }
 0x41a   :  { %v1270_v32 = vmul.f32 0.03125, %v1240_v31  ;;  %v1349_v40 = vmul.f32 %v1269_v16, %v1269_v16  ;;  %v1381_v47 = vsub.f32 %v3283_v35, %v1269_v16 }
 0x41b   :  { %v1304_v29 = vpop.xlane.xlu0 %1303 }
 0x41c   :  { %v1350_v34 = vmul.f32 %v1270_v32, %v1270_v32  ;;  %v1334_v25 = vmul.f32 0.03125, %v1304_v29  ;;  %v1382_v63 = vsub.f32 %v3286_v38, %v1270_v32 }
 0x41d   :  { %v1302_v39 = vpop.xlane.xlu1 %1301 }
 0x41e   :  { %v1366_v19 = vsub.f32 %v1334_v25, %v1350_v34  ;;  %v1333_v41 = vmul.f32 0.03125, %v1302_v39 }
 0x41f   :  { %v1242_v42 = vpop.xlane.xlu0 %1241 }
 0x420   :  { %v1398_v20 = vadd.f32 1e-05, %v1366_v19  ;;  %v1365_v43 = vsub.f32 %v1333_v41, %v1349_v40  ;;  %v1271_v44 = vmul.f32 0.03125, %v1242_v42 }
 0x421   :  { %v1306_v45 = vpop.xlane.xlu1 %1305 }
 0x422   :  { %2725 = vrsqrt.f32 %v1398_v20  ;;  %v1397_v22 = vadd.f32 1e-05, %v1365_v43  ;;  %v1351_v46 = vmul.f32 %v1271_v44, %v1271_v44  ;;  %v1335_v36 = vmul.f32 0.03125, %v1306_v45 }
 0x423   :  { %v1244_v50 = vpop.xlane.xlu0 %1243  ;;  %v1383_v25 = vsub.f32 %v3296_v48, %v1271_v44 }
 0x424   :  { %2727 = vrsqrt.f32 %v1397_v22  ;;  %v1272_v53 = vmul.f32 0.03125, %v1244_v50  ;;  %v1367_v54 = vsub.f32 %v1335_v36, %v1351_v46 }
 0x426   :  { %v1399_v55 = vadd.f32 1e-05, %v1367_v54  ;;  %v1352_v59 = vmul.f32 %v1272_v53, %v1272_v53  ;;  %v1384_v48 = vsub.f32 %v3301_v51, %v1272_v53 }
 0x427   :  { %v1308_v56 = vpop.xlane.xlu0 %1307  ;;  %v1246_v57 = vpop.xlane.xlu1 %1245 }
 0x428   :  { %v1336_v18 = vmul.f32 0.03125, %v1308_v56  ;;  %v3389_v60 = vmul.f32 0.03125, %v1246_v57  ;;  %2729 = vrsqrt.f32 %v1399_v55 }
 0x42a   :  { %v1368_v62 = vsub.f32 %v1336_v18, %v1352_v59  ;;  %v1353_v6 = vmul.f32 %v3389_v60, %v3389_v60  ;;  %v1385_v51 = vsub.f32 %v3305_v58, %v3389_v60 }
 0x42b   :  { %v1248_v1 = vpop.xlane.xlu0 %1247  ;;  %v1310_v3 = vpop.xlane.xlu1 %1309 }
 0x42c   :  { %v2726_v4 = vpop.eup %2725  ;;  %v1400_v5 = vadd.f32 1e-05, %v1368_v62  ;;  %v3394_v7 = vmul.f32 0.03125, %v1248_v1  ;;  %v1337_v24 = vmul.f32 0.03125, %v1310_v3 }
 0x42d   :  { %v1430_v13 = vmul.f32 %v2726_v4, %v1382_v63 }
 0x42e   :  { %v2728_v15 = vpop.eup %2727  ;;  %2731 = vrsqrt.f32 %v1400_v5  ;;  %v1369_v38 = vsub.f32 %v1337_v24, %v1353_v6  ;;  %v1354_v31 = vmul.f32 %v3394_v7, %v3394_v7  ;;  %v1386_v58 = vsub.f32 %v3310_v61, %v3394_v7 }
 0x42f   :  { %v1312_v10 = vpop.xlane.xlu0 %1311  ;;  %v1250_v30 = vpop.xlane.xlu1 %1249  ;;  %v1429_v23 = vmul.f32 %v2728_v15, %v1381_v47  ;;  %v1450_v28 = vmul.f32 %v3399_v8, %v1430_v13 }
 0x430   :  { %v1401_v32 = vadd.f32 1e-05, %v1369_v38  ;;  %v1338_v29 = vmul.f32 0.03125, %v1312_v10  ;;  %v3410_v35 = vmul.f32 0.03125, %v1250_v30 }
 0x431   :  { %v1449_v16 = vmul.f32 %v3399_v8, %v1429_v23  ;;  %v1470_v34 = vadd.f32 %v3405_v9, %v1450_v28 }
 0x432   :  { %2733 = vrsqrt.f32 %v1401_v32  ;;  %v1370_v39 = vsub.f32 %v1338_v29, %v1354_v31  ;;  %v2730_v40 = vpop.eup %2729  ;;  %v1355_v19 = vmul.f32 %v3410_v35, %v3410_v35  ;;  %v1387_v61 = vsub.f32 %v3321_v11, %v3410_v35 }
 0x433   :  { %v1252_v41 = vpop.xlane.xlu0 %1251  ;;  %v1314_v42 = vpop.xlane.xlu1 %1313  ;;  %v1469_v20 = vadd.f32 %v3405_v9, %v1449_v16  ;;  %v1431_v43 = vmul.f32 %v2730_v40, %v1383_v25  ;;  %v1486_v50 = vmax.f32 %v1470_v34, 0.0 }
 0x434   :  { %v1402_v45 = vadd.f32 1e-05, %v1370_v39  ;;  %v3418_v22 = vmul.f32 0.03125, %v1252_v41  ;;  %v1339_v46 = vmul.f32 0.03125, %v1314_v42 }
 0x435   :  { %v1485_v36 = vmax.f32 %v1469_v20, 0.0  ;;  %v1451_v57 = vmul.f32 %v3399_v8, %v1431_v43 }
 0x436   :  { %2735 = vrsqrt.f32 %v1402_v45  ;;  %v1371_v54 = vsub.f32 %v1339_v46, %v1355_v19  ;;  %v1356_v18 = vmul.f32 %v3418_v22, %v3418_v22  ;;  %v1388_v35 = vsub.f32 %v3325_v12, %v3418_v22 }
 0x437   :  { %v1316_v44 = vpop.xlane.xlu0 %1315  ;;  %v1254_v55 = vpop.xlane.xlu1 %1253  ;;  %v1501_v56 = vpack.c.bf16 %v1486_v50, %v1485_v36  ;;  %v1471_v24 = vadd.f32 %v3405_v9, %v1451_v57 }
 0x438   :  { %v2732_v59 = vpop.eup %2731  ;;  %v1403_v62 = vadd.f32 1e-05, %v1371_v54  ;;  %v1340_v63 = vmul.f32 0.03125, %v1316_v44  ;;  %v3424_v1 = vmul.f32 0.03125, %v1254_v55 }
 0x439   :  { %v1432_v3 = vmul.f32 %v2732_v59, %v1384_v48  ;;  %2540 = vmatprep.mubr.bf16.mxu1 %v1501_v56  ;;  %v1487_v32 = vmax.f32 %v1471_v24, 0.0 }
 0x43a   :  { %2737 = vrsqrt.f32 %v1403_v62  ;;  %v1372_v4 = vsub.f32 %v1340_v63, %v1356_v18  ;;  %v1357_v15 = vmul.f32 %v3424_v1, %v3424_v1  ;;  %v1389_v12 = vsub.f32 %v3332_v17, %v3424_v1 }
 0x43b   :  { %v1256_v53 = vpop.xlane.xlu0 %1255  ;;  %v1318_v5 = vpop.xlane.xlu1 %1317  ;;  %v1452_v6 = vmul.f32 %v3399_v8, %v1432_v3 }
 0x43c   :  { %v2734_v47 = vpop.eup %2733  ;;  %v1404_v13 = vadd.f32 1e-05, %v1372_v4  ;;  %v3432_v38 = vmul.f32 0.03125, %v1256_v53  ;;  %v1341_v10 = vmul.f32 0.03125, %v1318_v5 }
 0x43d   :  { %v1472_v30 = vadd.f32 %v3405_v9, %v1452_v6  ;;  %v1433_v23 = vmul.f32 %v2734_v47, %v1385_v51 }
 0x43e   :  { %2739 = vrsqrt.f32 %v1404_v13  ;;  %v1373_v28 = vsub.f32 %v1341_v10, %v1357_v15  ;;  %v1358_v25 = vmul.f32 %v3432_v38, %v3432_v38  ;;  %v1390_v1 = vsub.f32 %v3338_v37, %v3432_v38 }
 0x43f   :  { %v1320_v60 = vpop.xlane.xlu0 %1319  ;;  %v1258_v31 = vpop.xlane.xlu1 %1257  ;;  %v1488_v29 = vmax.f32 %v1472_v30, 0.0  ;;  %v1453_v16 = vmul.f32 %v3399_v8, %v1433_v23 }
 0x440   :  { %v2736_v34 = vpop.eup %2735  ;;  %v1405_v39 = vadd.f32 1e-05, %v1373_v28  ;;  %v1342_v40 = vmul.f32 0.03125, %v1320_v60  ;;  %v3440_v19 = vmul.f32 0.03125, %v1258_v31 }
 0x441   :  { %v1502_v41 = vpack.c.bf16 %v1488_v29, %v1487_v32  ;;  %v1434_v42 = vmul.f32 %v2736_v34, %v1386_v58  ;;  %v1473_v46 = vadd.f32 %v3405_v9, %v1453_v16 }
 0x442   :  { %2741 = vrsqrt.f32 %v1405_v39  ;;  %v1374_v20 = vsub.f32 %v1342_v40, %v1358_v25  ;;  %v1359_v54 = vmul.f32 %v3440_v19, %v3440_v19  ;;  %v1391_v37 = vsub.f32 %v3349_v49, %v3440_v19 }
 0x443   :  { %v1260_v7 = vpop.xlane.xlu0 %1259  ;;  %2541 = vmatmul.mubr.bf16.vlgmr.msra.gmra.mrb[36].mxu1 %v1502_v41  ;;  %v1322_v43 = vpop.xlane.xlu1 %1321  ;;  %v1454_v45 = vmul.f32 %v3399_v8, %v1434_v42  ;;  %v1489_v18 = vmax.f32 %v1473_v46, 0.0 }
 0x444   :  { %v2738_v36 = vpop.eup %2737  ;;  %v1406_v50 = vadd.f32 1e-05, %v1374_v20  ;;  %v3448_v48 = vmul.f32 0.03125, %v1260_v7  ;;  %v1343_v44 = vmul.f32 0.03125, %v1322_v43 }
 0x445   :  { %v1474_v55 = vadd.f32 %v3405_v9, %v1454_v45  ;;  %v1435_v56 = vmul.f32 %v2738_v36, %v1387_v61 }
 0x446   :  { %2743 = vrsqrt.f32 %v1406_v50  ;;  %v1375_v11 = vsub.f32 %v1343_v44, %v1359_v54  ;;  %v1360_v4 = vmul.f32 %v3448_v48, %v3448_v48  ;;  %v1392_v49 = vsub.f32 %v3353_v52, %v3448_v48 }
 0x447   :  { %v1324_v57 = vpop.xlane.xlu0 %1323  ;;  %v1262_v59 = vpop.xlane.xlu1 %1261  ;;  %v1490_v62 = vmax.f32 %v1474_v55, 0.0  ;;  %v1455_v63 = vmul.f32 %v3399_v8, %v1435_v56 }
 0x448   :  { %v2740_v3 = vpop.eup %2739  ;;  %v1407_v51 = vadd.f32 1e-05, %v1375_v11  ;;  %v1344_v53 = vmul.f32 0.03125, %v1324_v57  ;;  %v3456_v5 = vmul.f32 0.03125, %v1262_v59 }
 0x449   :  { %v1503_v6 = vpack.c.bf16 %v1490_v62, %v1489_v18  ;;  %v1436_v24 = vmul.f32 %v2740_v3, %v1388_v35  ;;  %v1475_v10 = vadd.f32 %v3405_v9, %v1455_v63 }
 0x44a   :  { %2745 = vrsqrt.f32 %v1407_v51  ;;  %v1376_v47 = vsub.f32 %v1344_v53, %v1360_v4  ;;  %v1361_v28 = vmul.f32 %v3456_v5, %v3456_v5 }
 0x44b   :  { %2544 = vmatprep.mubr.bf16.mxu1 %v1503_v6  ;;  %v1264_v22 = vpop.xlane.xlu0 %1263  ;;  %v1326_v13 = vpop.xlane.xlu1 %1325  ;;  %v1456_v15 = vmul.f32 %v3399_v8, %v1436_v24  ;;  %v1491_v34 = vmax.f32 %v1475_v10, 0.0 }
 0x44c   :  { %v2742_v30 = vpop.eup %2741  ;;  %v1408_v23 = vadd.f32 1e-05, %v1376_v47  ;;  %v3464_v58 = vmul.f32 0.03125, %v1264_v22  ;;  %v1345_v60 = vmul.f32 0.03125, %v1326_v13 }
 0x44d   :  { %v1476_v31 = vadd.f32 %v3405_v9, %v1456_v15  ;;  %v1437_v32 = vmul.f32 %v2742_v30, %v1389_v12  ;;  %v1393_v12 = vsub.f32 %v3360_v21, %v3456_v5 }
 0x44e   :  { %2747 = vrsqrt.f32 %v1408_v23  ;;  %v1377_v17 = vsub.f32 %v1345_v60, %v1361_v28  ;;  %v1362_v41 = vmul.f32 %v3464_v58, %v3464_v58  ;;  %v1394_v30 = vsub.f32 %v3366_v2, %v3464_v58 }
 0x44f   :  { %v1328_v29 = vpop.xlane.xlu0 %1327  ;;  %v1266_v16 = vpop.xlane.xlu1 %1265  ;;  %v1492_v25 = vmax.f32 %v1476_v31, 0.0  ;;  %v1457_v39 = vmul.f32 %v3399_v8, %v1437_v32 }
 0x450   :  { %v2744_v40 = vpop.eup %2743  ;;  %v1409_v42 = vadd.f32 1e-05, %v1377_v17  ;;  %v1346_v20 = vmul.f32 0.03125, %v1328_v29  ;;  %v1283_v61 = vmul.f32 0.03125, %v1266_v16 }
 0x451   :  { %v1504_v7 = vpack.c.bf16 %v1492_v25, %v1491_v34  ;;  %v1438_v43 = vmul.f32 %v2744_v40, %v1390_v1  ;;  %v1477_v50 = vadd.f32 %v3405_v9, %v1457_v39 }
 0x452   :  { %2749 = vrsqrt.f32 %v1409_v42  ;;  %v1378_v45 = vsub.f32 %v1346_v20, %v1362_v41  ;;  %v1363_v55 = vmul.f32 %v1283_v61, %v1283_v61  ;;  %v1395_v32 = vsub.f32 %v3377_v26, %v1283_v61 }
 0x453   :  { %2545 = vmatmul.mubr.bf16.gmra.mrb[40].mxu1 %v1504_v7  ;;  %v1268_v38 = vpop.xlane.xlu0 %1267  ;;  %v1330_v46 = vpop.xlane.xlu1 %1329  ;;  %v1458_v36 = vmul.f32 %v3399_v8, %v1438_v43  ;;  %v1493_v18 = vmax.f32 %v1477_v50, 0.0  ;;  %v2714_v50 = vld [vmem:[#allocation7 + $0x138] sm:$0xff]  }
 0x454   :  { %v2746_v54 = vpop.eup %2745  ;;  %v1410_v44 = vadd.f32 1e-05, %v1378_v45  ;;  %v1284_v56 = vmul.f32 0.03125, %v1268_v38  ;;  %v1347_v11 = vmul.f32 0.03125, %v1330_v46  ;;  %v2709_v38 = vld [vmem:[#allocation7 + $0x110] sm:$0xff]   ;;  %v2712_v46 = vld [vmem:[#allocation7 + $0x128] sm:$0xff]  }
 0x455   :  { %v1478_v35 = vadd.f32 %v3405_v9, %v1458_v36  ;;  %v1439_v57 = vmul.f32 %v2746_v54, %v1391_v37  ;;  %v2708_v37 = vld [vmem:[#allocation7 + $0x108] sm:$0xff]   ;;  %v2713_v36 = vld [vmem:[#allocation7 + $0x130] sm:$0xff]  }
 0x456   :  { %2751 = vrsqrt.f32 %v1410_v44  ;;  %v1379_v59 = vsub.f32 %v1347_v11, %v1363_v55  ;;  %v1364_v4 = vmul.f32 %v1284_v56, %v1284_v56  ;;  %v1396_v2 = vsub.f32 %v3381_v27, %v1284_v56  ;;  %v2707_v27 = vld [vmem:[#allocation7 + $0x100] sm:$0xff]  }
 0x457   :  { %v1332_v19 = vpop.xlane.xlu0 %1331  ;;  %v1494_v62 = vmax.f32 %v1478_v35, 0.0  ;;  %v1459_v63 = vmul.f32 %v3399_v8, %v1439_v57  ;;  %2577 = vmatpush3.bf16.msra.mxu1 %v2707_v27  ;;  %v2207_v44 = vld [vmem:[%s3576_s5 + $0x7] ss:$0 sm:$0xff] }
 0x458   :  { %v2748_v3 = vpop.eup %2747  ;;  %v1411_v51 = vadd.f32 1e-05, %v1379_v59  ;;  %v1348_v53 = vmul.f32 0.03125, %v1332_v19  ;;  %2578 = vmatprep.subr.bf16.mxu1 %v2837_v0 }
 0x459   :  { %v1505_v6 = vpack.c.bf16 %v1494_v62, %v1493_v18  ;;  %v1440_v24 = vmul.f32 %v2748_v3, %v1392_v49  ;;  %v1479_v52 = vadd.f32 %v3405_v9, %v1459_v63 }
 0x45a   :  { %2753 = vrsqrt.f32 %v1411_v51  ;;  %v1380_v47 = vsub.f32 %v1348_v53, %v1364_v4 }
 0x45b   :  { %2548 = vmatprep.mubr.bf16.mxu1 %v1505_v6  ;;  %v1460_v22 = vmul.f32 %v3399_v8, %v1440_v24  ;;  %v1495_v23 = vmax.f32 %v1479_v52, 0.0  ;;  %2579 = vmatpush3.bf16.msra.mxu1 %v2708_v37 }
 0x45c   :  { %v2750_v48 = vpop.eup %2749  ;;  %v1412_v13 = vadd.f32 1e-05, %v1380_v47  ;;  %2580 = vmatprep.subr.bf16.mxu1 %v2837_v0 }
 0x45d   :  { %v1480_v15 = vadd.f32 %v3405_v9, %v1460_v22  ;;  %v1441_v10 = vmul.f32 %v2750_v48, %v1393_v12 }
 0x45e   :  { %2755 = vrsqrt.f32 %v1412_v13 }
 0x45f   :  { %v1496_v28 = vmax.f32 %v1480_v15, 0.0  ;;  %v1461_v60 = vmul.f32 %v3399_v8, %v1441_v10  ;;  %2581 = vmatpush3.bf16.msra.mxu1 %v2709_v38  ;;  %v2715_v38 = vld [vmem:[#allocation7 + $0x140] sm:$0xff]  }
 0x460   :  { %v2752_v31 = vpop.eup %2751  ;;  %2582 = vmatprep.subr.bf16.mxu1 %v2837_v0 }
 0x461   :  { %v1506_v21 = vpack.c.bf16 %v1496_v28, %v1495_v23  ;;  %v1442_v5 = vmul.f32 %v2752_v31, %v1394_v30  ;;  %v1481_v1 = vadd.f32 %v3405_v9, %v1461_v60 }
 0x463   :  { %2549 = vmatmul.mubr.bf16.gmra.mrb[44].mxu1 %v1506_v21  ;;  %v1462_v17 = vmul.f32 %v3399_v8, %v1442_v5  ;;  %v1497_v58 = vmax.f32 %v1481_v1, 0.0 }
 0x464   :  { %v2754_v29 = vpop.eup %2753 }
 0x465   :  { %v1482_v16 = vadd.f32 %v3405_v9, %v1462_v17  ;;  %v1443_v34 = vmul.f32 %v2754_v29, %v1395_v32 }
 0x467   :  { %v1498_v25 = vmax.f32 %v1482_v16, 0.0  ;;  %v1463_v39 = vmul.f32 %v3399_v8, %v1443_v34 }
 0x468   :  { %v2756_v40 = vpop.eup %2755 }
 0x469   :  { %v1507_v41 = vpack.c.bf16 %v1498_v25, %v1497_v58  ;;  %v1444_v42 = vmul.f32 %v2756_v40, %v1396_v2  ;;  %v1483_v20 = vadd.f32 %v3405_v9, %v1463_v39  ;;  %v1676_v2 = vshrl.u32 %v345_v14, 7  ;;  %v2216_v25 = vld [vmem:[%s3573_s2] ss:$0 sm:$0xff]  ;;  %v2701_v14 = vld [vmem:[#allocation7 + $0xd0] sm:$0xff]  }
 0x46a   :  { %v2699_v39 = vld [vmem:[#allocation7 + $0xc0] sm:$0xff]   ;;  %v2840_v40 = vmov 1.0|1.0  }
 0x46b   :  { %2552 = vmatprep.mubr.bf16.mxu1 %v1507_v41  ;;  %v1464_v26 = vmul.f32 %v3399_v8, %v1444_v42  ;;  %v1499_v7 = vmax.f32 %v1483_v20, 0.0  ;;  %v2710_v8 = vld [vmem:[#allocation7 + $0x118] sm:$0xff]   ;;  %vm1681_vm8 = vcmp.eq.s32.totalorder %v1676_v2, %v2216_v25  ;;  %v2700_v41 = vld [vmem:[#allocation7 + $0xc8] sm:$0xff]  }
 0x46c   :  { %2583 = vmatpush3.bf16.msra.mxu1 %v2710_v8  ;;  %vm2218_vm6 = vmpackc.low %vm1681_vm8, %vm1681_vm8  ;;  %v2702_v42 = vld [vmem:[#allocation7 + $0xd8] sm:$0xff]   ;;  %v2704_v20 = vld [vmem:[#allocation7 + $0xe8] sm:$0xff]  }
 0x46d   :  { %v1484_v61 = vadd.f32 %v3405_v9, %v1464_v26  ;;  %v2711_v9 = vld [vmem:[#allocation7 + $0x120] sm:$0xff]   ;;  %2584 = vmatprep.subr.bf16.mxu1 %v2837_v0 }
 0x46e   :  { %v2703_v26 = vld [vmem:[#allocation7 + $0xe0] sm:$0xff]  }
 0x46f   :  { %v1500_v43 = vmax.f32 %v1484_v61, 0.0  ;;  %v2705_v61 = vld [vmem:[#allocation7 + $0xf0] sm:$0xff]  }
 0x470   :  { %2585 = vmatpush3.bf16.msra.mxu1 %v2711_v9 }
 0x471   :  { %v1508_v45 = vpack.c.bf16 %v1500_v43, %v1499_v7  ;;  %2586 = vmatprep.subr.bf16.mxu1 %v2837_v0  ;;  %v2123_v7 = vld [vmem:[%s3576_s5 + $0x3] ss:$0 sm:$0xff]  ;;  %v2706_v43 = vld [vmem:[#allocation7 + $0xf8] sm:$0xff]  }
 0x473   :  { %2553 = vmatmul.mubr.bf16.gmra.mrb[48].mxu1 %v1508_v45  ;;  %v306_v45 = vadd.f32 %v2123_v7, %v3253_v33  ;;  %v2717_v33 = vld [vmem:[#allocation7 + $0x150] sm:$0xff]  }
 0x474   :  { %2592 = vmatprep.mubr.msk.bf16.mxu1 %vm2838_vm0, %v2837_v0  ;;  %2587 = vmatpush3.bf16.msra.mxu1 %v2712_v46 }
 0x475   :  { %2588 = vmatprep.subr.bf16.mxu1 %v2837_v0  ;;  %v1740_v27 = vpack.c.bf16 %v306_v45, %v306_v45 }
 0x478   :  { %2589 = vmatpush3.bf16.msra.mxu1 %v2713_v36 }
 0x479   :  { %2590 = vmatprep.subr.bf16.mxu1 %v2837_v0 }
 0x47c   :  { %2591 = vmatpush3.bf16.msra.mxu1 %v2714_v50  ;;  %v2716_v50 = vld [vmem:[#allocation7 + $0x148] sm:$0xff]  }
 0x47d   :  { %2616 = vmatprep.subr.bf16.mxu1 %v2837_v0 }
 0x516   :  { %v2542_v54 = vpop.f32.mrb[36].mxu1 }
 0x517   :  { %v1612_v55 = vpop.f32.mrb[37].mxu1  ;;  %v1621_v11 = vadd.f32 %v2542_v54, %v2207_v44  ;;  %v2718_v54 = vld [vmem:[#allocation7 + $0x158] sm:$0xff]  }
 0x518   :  { %v2543_v56 = vpop.f32.mrb[38].mxu1  ;;  %v1613_v59 = vadd.f32 %v2207_v44, %v1612_v55  ;;  %v2720_v55 = vld [vmem:[#allocation7 + $0x168] sm:$0xff]  }
 0x519   :  { %v1624_v35 = vadd.f32 %v2543_v56, %v2207_v44  ;;  %v1615_v57 = vpop.f32.mrb[39].mxu1  ;;  %v2721_v56 = vld [vmem:[#allocation7 + $0x170] sm:$0xff]  }
 0x51a   :  { %v1616_v49 = vadd.f32 %v2207_v44, %v1615_v57 }
 0x51b   :  { %v1687_v19 = vpack.c.bf16 %v1624_v35, %v1621_v11  ;;  %v2722_v11 = vld [vmem:[#allocation7 + $0x178] sm:$0xff]   ;;  %v1957_v35 = vld [vmem:[%s3574_s3] sm:$0xff] }
 0x51c   :  { %v1686_v18 = vpack.c.bf16 %v1616_v49, %v1613_v59  ;;  %v1958_v57 = vpack.c.bf16 %v1957_v35, %v1957_v35 }
 0x51e   :  { %2557 = vmatpush3.bf16.msra.mxu0 %v1686_v18 }
 0x51f   :  { %2558 = vmatprep.subr.bf16.mxu0 %v2837_v0 }
 0x522   :  { %2559 = vmatpush3.bf16.msra.mxu0 %v1687_v19 }
 0x523   :  { %2560 = vmatprep.subr.bf16.mxu0 %v2837_v0 }
 0x526   :  { %v2546_v62 = vpop.f32.mrb[40].mxu1 }
 0x527   :  { %v1628_v63 = vpop.f32.mrb[41].mxu1  ;;  %v1637_v4 = vadd.f32 %v2546_v62, %v2207_v44 }
 0x528   :  { %v2547_v3 = vpop.f32.mrb[42].mxu1  ;;  %v1629_v6 = vadd.f32 %v2207_v44, %v1628_v63 }
 0x529   :  { %v1640_v51 = vadd.f32 %v2547_v3, %v2207_v44  ;;  %v1631_v53 = vpop.f32.mrb[43].mxu1 }
 0x52a   :  { %v1632_v24 = vadd.f32 %v2207_v44, %v1631_v53  ;;  %v2236_v53 = vld [vmem:[%s3576_s5 + $0x8] ss:$0 sm:$0xff] }
 0x52b   :  { %v1689_v47 = vpack.c.bf16 %v1640_v51, %v1637_v4 }
 0x52c   :  { %v1688_v12 = vpack.c.bf16 %v1632_v24, %v1629_v6 }
 0x52e   :  { %2561 = vmatpush3.bf16.msra.mxu0 %v1688_v12 }
 0x52f   :  { %2562 = vmatprep.subr.bf16.mxu0 %v2837_v0 }
 0x532   :  { %2563 = vmatpush3.bf16.msra.mxu0 %v1689_v47 }
 0x533   :  { %2564 = vmatprep.subr.bf16.mxu0 %v2837_v0 }
 0x536   :  { %v2550_v22 = vpop.f32.mrb[44].mxu1 }
 0x537   :  { %v1644_v52 = vpop.f32.mrb[45].mxu1  ;;  %v1653_v13 = vadd.f32 %v2550_v22, %v2207_v44 }
 0x538   :  { %v2551_v48 = vpop.f32.mrb[46].mxu1  ;;  %v1645_v30 = vadd.f32 %v2207_v44, %v1644_v52 }
 0x539   :  { %v1656_v15 = vadd.f32 %v2551_v48, %v2207_v44  ;;  %v1647_v10 = vpop.f32.mrb[47].mxu1 }
 0x53a   :  { %v1648_v23 = vadd.f32 %v2207_v44, %v1647_v10 }
 0x53b   :  { %v1691_v28 = vpack.c.bf16 %v1656_v15, %v1653_v13 }
 0x53c   :  { %v1690_v60 = vpack.c.bf16 %v1648_v23, %v1645_v30 }
 0x53e   :  { %2565 = vmatpush3.bf16.msra.mxu0 %v1690_v60 }
 0x53f   :  { %2566 = vmatprep.subr.bf16.mxu0 %v2837_v0 }
 0x542   :  { %2567 = vmatpush3.bf16.msra.mxu0 %v1691_v28 }
 0x543   :  { %2568 = vmatprep.subr.bf16.mxu0 %v2837_v0 }
 0x546   :  { %v2554_v31 = vpop.f32.mrb[48].mxu1 }
 0x547   :  { %v1660_v21 = vpop.f32.mrb[49].mxu1  ;;  %v1669_v32 = vadd.f32 %v2554_v31, %v2207_v44 }
 0x548   :  { %v2555_v5 = vpop.f32.mrb[50].mxu1  ;;  %v1661_v29 = vadd.f32 %v2207_v44, %v1660_v21 }
 0x549   :  { %v1672_v17 = vadd.f32 %v2555_v5, %v2207_v44  ;;  %v1663_v1 = vpop.f32.mrb[51].mxu1 }
 0x54a   :  { %v1664_v16 = vadd.f32 %v2207_v44, %v1663_v1  ;;  %v2719_v44 = vld [vmem:[#allocation7 + $0x160] sm:$0xff]   ;;  %v2247_v1 = vld [vmem:[%s3576_s5 + $0xa] ss:$0 sm:$0xff] }
 0x54b   :  { %v1693_v34 = vpack.c.bf16 %v1672_v17, %v1669_v32  ;;  %v2246_v32 = vld [vmem:[%s3576_s5 + $0x9] ss:$0 sm:$0xff] }
 0x54c   :  { %v1692_v58 = vpack.c.bf16 %v1664_v16, %v1661_v29 }
 0x54e   :  { %2569 = vmatpush3.bf16.msra.mxu0 %v1692_v58 }
 0x54f   :  { %2570 = vmatprep.subr.bf16.mxu0 %v2837_v0 }
 0x552   :  { %2571 = vmatpush3.bf16.msra.mxu0 %v1693_v34 }
 0x553   :  { %2596 = vmatprep.subr.bf16.mxu0 %v2837_v0 }
 0x555   :  { %2573 = vmatmul.mubr.msk.bf16.vlgmr.msra.gmra.mrb[52].mxu0 %vm2218_vm6, %v2840_v40 }
 0x556   :  { %2597 = vmatpush3.bf16.msra.mxu0 %v2699_v39  ;;  %2612 = vmatprep.mubr.msk.bf16.mxu0 %vm2838_vm0, %v2837_v0 }
 0x557   :  { %2598 = vmatprep.subr.bf16.mxu0 %v2837_v0 }
 0x55a   :  { %2599 = vmatpush3.bf16.msra.mxu0 %v2700_v41 }
 0x55b   :  { %2600 = vmatprep.subr.bf16.mxu0 %v2837_v0 }
 0x55e   :  { %2601 = vmatpush3.bf16.msra.mxu0 %v2701_v14 }
 0x55f   :  { %2602 = vmatprep.subr.bf16.mxu0 %v2837_v0 }
 0x562   :  { %2603 = vmatpush3.bf16.msra.mxu0 %v2702_v42 }
 0x563   :  { %2604 = vmatprep.subr.bf16.mxu0 %v2837_v0 }
 0x566   :  { %2605 = vmatpush3.bf16.msra.mxu0 %v2703_v26 }
 0x567   :  { %2606 = vmatprep.subr.bf16.mxu0 %v2837_v0 }
 0x56a   :  { %2607 = vmatpush3.bf16.msra.mxu0 %v2704_v20 }
 0x56b   :  { %2608 = vmatprep.subr.bf16.mxu0 %v2837_v0 }
 0x56e   :  { %2609 = vmatpush3.bf16.msra.mxu0 %v2705_v61 }
 0x56f   :  { %2610 = vmatprep.subr.bf16.mxu0 %v2837_v0 }
 0x572   :  { %2611 = vmatpush3.bf16.msra.mxu0 %v2706_v43 }
 0x575   :  { %2613 = vmatmul.mubr.bf16.vlgmr.msra.gmra.mrb[56].mxu0 %v1740_v27 }
 0x628   :  { %v1728_v37 = vpop.f32.mrb[52].mxu0 }
 0x629   :  { %v1758_v8 = vpack.c.bf16 %v1728_v37, %v1728_v37  ;;  %v2574_v9 = vpop.f32.mrb[53].mxu0 }
 0x62a   :  { %v1731_v46 = vpop.f32.mrb[54].mxu0 }
 0x62b   :  { %2593 = vmatmul.mubr.bf16.vlgmr.msra.gmra.mrb[52].mxu1 %v1758_v8  ;;  %v2575_v36 = vpop.f32.mrb[55].mxu0 }
 0x62c   :  { %2617 = vmatpush3.bf16.msra.mxu1 %v2715_v38  ;;  %2632 = vmatprep.mubr.msk.bf16.mxu1 %vm2838_vm0, %v2837_v0 }
 0x62d   :  { %2618 = vmatprep.subr.bf16.mxu1 %v2837_v0 }
 0x630   :  { %2619 = vmatpush3.bf16.msra.mxu1 %v2716_v50 }
 0x631   :  { %2620 = vmatprep.subr.bf16.mxu1 %v2837_v0 }
 0x634   :  { %2621 = vmatpush3.bf16.msra.mxu1 %v2717_v33 }
 0x635   :  { %2622 = vmatprep.subr.bf16.mxu1 %v2837_v0 }
 0x638   :  { %2623 = vmatpush3.bf16.msra.mxu1 %v2718_v54 }
 0x639   :  { %2624 = vmatprep.subr.bf16.mxu1 %v2837_v0 }
 0x63c   :  { %2625 = vmatpush3.bf16.msra.mxu1 %v2719_v44 }
 0x63d   :  { %2626 = vmatprep.subr.bf16.mxu1 %v2837_v0 }
 0x640   :  { %2627 = vmatpush3.bf16.msra.mxu1 %v2720_v55 }
 0x641   :  { %2628 = vmatprep.subr.bf16.mxu1 %v2837_v0 }
 0x644   :  { %2629 = vmatpush3.bf16.msra.mxu1 %v2721_v56 }
 0x645   :  { %2630 = vmatprep.subr.bf16.mxu1 %v2837_v0  ;;  %v2245_v0 = vld [vmem:[%s3576_s5 + $0xb] ss:$0 sm:$0xff] }
 0x648   :  { %2631 = vmatpush3.bf16.msra.mxu1 %v2722_v11  ;;  %v1945_v59 = vpop.f32.mrb[56].mxu0 }
 0x649   :  { %v2614_v49 = vpop.f32.mrb[57].mxu0 }
 0x64a   :  { %v1948_v19 = vpop.f32.mrb[58].mxu0 }
 0x64b   :  { %2633 = vmatmul.mubr.bf16.vlgmr.msra.gmra.mrb[56].mxu1 %v1958_v57  ;;  %v2615_v18 = vpop.f32.mrb[59].mxu0 }
 0x6fe   :  { %v1857_v62 = vpop.f32.mrb[52].mxu1 }
 0x6ff   :  { %v1946_v63 = vadd.f32 %v1945_v59, %v1857_v62  ;;  %v2594_v3 = vpop.f32.mrb[53].mxu1 }
 0x700   :  { %v1860_v4 = vpop.f32.mrb[54].mxu1 }
 0x701   :  { %v2595_v51 = vpop.f32.mrb[55].mxu1  ;;  %v1956_v6 = vadd.f32 %v2236_v53, %v1946_v63 }
 0x71e   :  { %v2057_v24 = vpop.f32.mrb[56].mxu1 }
 0x71f   :  { %v2063_v47 = vadd.f32 %v2057_v24, %v1956_v6  ;;  %v2634_v12 = vpop.f32.mrb[57].mxu1 }
 0x720   :  { %v2060_v22 = vpop.f32.mrb[58].mxu1 }
 0x721   :  { %v2069_v52 = vadd.f32 %v2245_v0, %v2063_v47  ;;  %v2635_v48 = vpop.f32.mrb[59].mxu1 }
 0x723   :  { %2072 = vadd.xlane.f32.xlu1 %v2069_v52  ;;  %v2075_v13 = vmul.f32 %v2069_v52, %v2069_v52 }
 0x725   :  { %2076 = vadd.xlane.f32.xlu0 %v2075_v13 }
 0x7b0   :  { %v2073_v15 = vpop.xlane.xlu1 %2072 }
 0x7b1   :  { %v2074_v10 = vmul.f32 0.03125, %v2073_v15 }
 0x7b2   :  { %v2077_v30 = vpop.xlane.xlu0 %2076 }
 0x7b3   :  { %v2079_v23 = vmul.f32 %v2074_v10, %v2074_v10  ;;  %v2078_v28 = vmul.f32 0.03125, %v2077_v30  ;;  %v2081_v21 = vsub.f32 %v2069_v52, %v2074_v10 }
 0x7b5   :  { %v2080_v60 = vsub.f32 %v2078_v28, %v2079_v23 }
 0x7b7   :  { %v2082_v31 = vadd.f32 1e-05, %v2080_v60 }
 0x7b9   :  { %2757 = vrsqrt.f32 %v2082_v31 }
 0x7c3   :  { %v2758_v5 = vpop.eup %2757 }
 0x7c4   :  { %v2084_v17 = vmul.f32 %v2758_v5, %v2081_v21 }
 0x7c6   :  { %v2089_v29 = vmul.f32 %v2246_v32, %v2084_v17 }
 0x7c8   :  { %v2094_v16 = vadd.f32 %v2247_v1, %v2089_v29 }
 0x7ca   :  { %2095 = vst [vmem:[#allocation9] sm:$0xff] %v2094_v16 }
 0x7cb   :  { %2814 = shalt.err (!%p2811_p6)
}
 0x7cc   :  { %s2815_s27 = scalar_lea.hbm %s3579_s8, 128 }
 0x7cd   :  { %p2816_p7 = scmp.ne.s32.totalorder %s3579_s8, %s2815_s27  ;;  %p2819_p8 = scmp.lt.u32.totalorder %s2815_s27, %s3579_s8 }
 0x7cf   :  { %p2821_p9 = pnand %p2819_p8, %p2816_p7 }
 0x7d1   :  { %2824 = shalt.err (!%p2821_p9)
}
 0x7d2   :  { %2105 = dma.vmem_to_hbm [thread:$0]  %s2103_s23, 128, %s3579_s8, [#allocation6]  }
 0x7d3   :  { %2829 = dma.done.wait [#allocation6], 128  }
 0x7d4   :  { %2830 = vsyncadd [#allocation6], 4294967168 }
 0x7d5   :  { %2109 = vsyncpa [#allocation5], 1 }
 0x7d6   :  { %2110 = vsyncpa [#allocation8], 1 }
 0x7d7   :  { %2111 = vsyncpa [#allocation6], 1 }

</bundles_post_ra>
